<compile_context>
chip_gen: v6e
topology: v6e:2x2x1
jax: 0.10.0
libtpu: 0.0.40
codegen_flags: <defaults>
</compile_context>

<pallas_src>
import functools
import math

import numpy as np
import jax
import jax.numpy as jnp
from jax import lax
from jax.experimental import pallas as pl
from jax.experimental.pallas import tpu as pltpu


def _round_up(x, m):
    return ((x + m - 1) // m) * m


def _pad_cols(w, width):
    return jnp.pad(w, ((0, 0), (0, width - w.shape[1])))


# -----------------------------------------------------------------------------
# Pallas kernel: one sequence (one batch element) per grid step.
# -----------------------------------------------------------------------------
def mamba_layer_kernel(x_ref, ln_g_ref, ln_b_ref, w_in_ref, conv_w_ref,
                       conv_b_ref, w_dbc_ref, b_dt_ref, a_neg_ref, d_ref,
                       w_out_ref, o_ref,
                       dA_scr, dB_scr, cB_scr, h_scr, y_scr, *,
                       seq_len, chunk, d_inner, d_state, seg_in, seg_dt,
                       seg_s, matmul_dtype):
    f32 = jnp.float32
    x = x_ref[0].astype(f32)                                    # (N, C)

    # ---- LayerNorm (eps=1e-5, elementwise affine) ----
    mean = jnp.mean(x, axis=-1, keepdims=True)
    var = jnp.mean((x - mean) ** 2, axis=-1, keepdims=True)
    xn = (x - mean) * lax.rsqrt(var + 1e-5) * ln_g_ref[...] + ln_b_ref[...]

    # ---- in_proj: single lane-padded fused matmul, 128-aligned slices ----
    xz = jnp.dot(xn.astype(matmul_dtype), w_in_ref[...],
                 preferred_element_type=f32)                    # (N, 2*seg_in)
    xc = xz[:, :d_inner]                                        # conv branch
    z = xz[:, seg_in:seg_in + d_inner]                          # gate branch

    # ---- causal depthwise conv1d (per-sequence -> no boundary masks) ----
    cw = conv_w_ref[...]                                        # (d_conv, d_inner)
    d_conv = cw.shape[0]
    xpad = jnp.concatenate(
        [jnp.zeros((d_conv - 1, d_inner), f32), xc], axis=0)
    conv = jnp.zeros((seq_len, d_inner), f32) + conv_b_ref[...]
    for k in range(d_conv):
        conv = conv + xpad[k:k + seq_len, :] * cw[k:k + 1, :]
    # TODO(synk): use pltpu.roll along the sublane (time) axis for the shifted
    # taps so they run on the idle XLU slot instead of materializing slices.

    # SiLU (sigmoid denominator on the EUP reciprocal slot)
    u = conv * pl.reciprocal(1.0 + jnp.exp(-conv), approx=True)

    # ---- fused dt/B/C projection (dt_proj folded into x_proj on the host) ----
    dbc = jnp.dot(u.astype(matmul_dtype), w_dbc_ref[...],
                  preferred_element_type=f32)                   # (N, seg_dt+2*seg_s)
    dt = dbc[:, :d_inner] + b_dt_ref[...]
    dt = jnp.where(dt > 20.0, dt,
                   jnp.log(1.0 + jnp.exp(jnp.minimum(dt, 20.0))))  # softplus
    Bm = dbc[:, seg_dt:seg_dt + d_state]                        # (N, d_state)
    Cm = dbc[:, seg_dt + seg_s:seg_dt + seg_s + d_state]        # (N, d_state)

    # ---- selective scan: serial only over time, chunked batched precompute ----
    # State h is (d_state, d_inner); the per-step loop body is a single FMA
    # plus a sublane reduce for y.  dA / dB / broadcast-C for a whole chunk are
    # produced as batched tensors and staged in VMEM scratch, off the
    # recurrence's critical path.
    A_neg = a_neg_ref[...]                                      # (d_state, d_inner)
    dtu = dt * u
    h_scr[...] = jnp.zeros_like(h_scr)

    c0 = 0
    while c0 < seq_len:                       # static Python loop over chunks
        T = min(chunk, seq_len - c0)
        dt_c = dt[c0:c0 + T]
        dA_scr[0:T] = jnp.exp(dt_c[:, None, :] * A_neg[None, :, :])
        dB_scr[0:T] = Bm[c0:c0 + T][:, :, None] * dtu[c0:c0 + T][:, None, :]
        cB_scr[0:T] = jnp.broadcast_to(Cm[c0:c0 + T][:, :, None],
                                       (T, d_state, d_inner))
        base = c0

        @pl.loop(0, T)
        def _scan_step(t):
            h = dA_scr[t] * h_scr[...] + dB_scr[t]     # recurrence critical path
            h_scr[...] = h
            y_scr[pl.ds(base + t, 1), :] = jnp.sum(h * cB_scr[t], axis=0,
                                                   keepdims=True)

        c0 += T
    # TODO(synk): for d_inner < 128 (toy sizes) pack two sequences or two
    # d_inner halves along lanes so the per-step FMA uses full (8,128) vregs.

    # ---- D skip connection + SiLU(z) gate ----
    y = y_scr[...] + u * d_ref[...]
    y = y * (z * pl.reciprocal(1.0 + jnp.exp(-z), approx=True))

    # ---- out_proj ----
    out = jnp.dot(y.astype(matmul_dtype), w_out_ref[...],
                  preferred_element_type=f32)
    # TODO(synk): for v5e, fold rows into lanes so the (N, C=32) output store is
    # lane-dense instead of a masked partial store.
    o_ref[0] = out.astype(o_ref.dtype)


# -----------------------------------------------------------------------------
# Wrapper: host-side parameter algebra / layout + pallas_call.
# -----------------------------------------------------------------------------
def mamba_layer(x, params, *, matmul_dtype=jnp.float32, scan_chunk=128):
    (ln_g, ln_b, w_in, conv_w, conv_b, w_xp, w_dt, b_dt, a_log, d_p,
     w_out) = params
    B, N, C = x.shape
    d_inner = w_in.shape[1] // 2
    dt_rank = w_dt.shape[0]
    d_state = a_log.shape[1]

    # in_proj x / z halves, re-fused with 128-lane-aligned (padded) segments
    seg_in = _round_up(d_inner, 128)
    w_in_f = jnp.concatenate(
        [_pad_cols(w_in[:, :d_inner], seg_in),
         _pad_cols(w_in[:, d_inner:], seg_in)], axis=1)         # (C, 2*seg_in)

    # dt_proj folded into x_proj; dt/B/C fused into one lane-padded matmul
    w_dt_full = w_xp[:, :dt_rank] @ w_dt                        # (d_inner, d_inner)
    w_b = w_xp[:, dt_rank:dt_rank + d_state]
    w_c = w_xp[:, dt_rank + d_state:]
    seg_dt = _round_up(d_inner, 128)
    seg_s = _round_up(d_state, 128)
    w_dbc = jnp.concatenate(
        [_pad_cols(w_dt_full, seg_dt), _pad_cols(w_b, seg_s),
         _pad_cols(w_c, seg_s)], axis=1)                        # (d_inner, seg_dt+2*seg_s)

    a_neg = (-jnp.exp(a_log)).T                 # (d_state, d_inner), hoisted off-kernel

    md = matmul_dtype
    w_in_f = w_in_f.astype(md)
    w_dbc = w_dbc.astype(md)
    w_out_m = w_out.astype(md)

    chunk = min(N, scan_chunk)

    kernel = functools.partial(
        mamba_layer_kernel, seq_len=N, chunk=chunk, d_inner=d_inner,
        d_state=d_state, seg_in=seg_in, seg_dt=seg_dt, seg_s=seg_s,
        matmul_dtype=md)

    weights = (ln_g, ln_b, w_in_f, conv_w, conv_b, w_dbc, b_dt, a_neg, d_p,
               w_out_m)

    def _full_block(a):
        nd = a.ndim
        return pl.BlockSpec(a.shape, lambda b: (0,) * nd)

    # TODO(synk): for small B and long N, stack several sequences per grid step
    # along sublanes and run the scan batch-parallel to cut the serial step count.
    return pl.pallas_call(
        kernel,
        out_shape=jax.ShapeDtypeStruct((B, N, C), x.dtype),
        grid=(B,),
        in_specs=[pl.BlockSpec((1, N, C), lambda b: (b, 0, 0))]
                 + [_full_block(w) for w in weights],
        out_specs=pl.BlockSpec((1, N, C), lambda b: (b, 0, 0)),
        scratch_shapes=[
            pltpu.VMEM((chunk, d_state, d_inner), jnp.float32),  # dA chunk
            pltpu.VMEM((chunk, d_state, d_inner), jnp.float32),  # dB chunk
            pltpu.VMEM((chunk, d_state, d_inner), jnp.float32),  # C broadcast chunk
            pltpu.VMEM((d_state, d_inner), jnp.float32),         # recurrence state h
            pltpu.VMEM((N, d_inner), jnp.float32),               # per-token y
        ],
        compiler_params=pltpu.CompilerParams(
            dimension_semantics=("parallel",),
            vmem_limit_bytes=32 * 1024 * 1024),
    )(x, *weights)


# -----------------------------------------------------------------------------
# Pure-JAX reference (same math as the PyTorch module).
# -----------------------------------------------------------------------------
def mamba_layer_ref(x, params):
    (ln_g, ln_b, w_in, conv_w, conv_b, w_xp, w_dt, b_dt, a_log, d_p,
     w_out) = params
    mean = jnp.mean(x, -1, keepdims=True)
    var = jnp.mean((x - mean) ** 2, -1, keepdims=True)
    xn = (x - mean) / jnp.sqrt(var + 1e-5) * ln_g + ln_b
    xz = jnp.einsum('bnc,cd->bnd', xn, w_in)
    d_inner = xz.shape[-1] // 2
    xc, z = xz[..., :d_inner], xz[..., d_inner:]
    d_conv = conv_w.shape[0]
    Bb, N = xc.shape[0], xc.shape[1]
    xpad = jnp.concatenate(
        [jnp.zeros((Bb, d_conv - 1, d_inner), jnp.float32), xc], axis=1)
    conv = conv_b + sum(xpad[:, k:k + N, :] * conv_w[k][None, None, :]
                        for k in range(d_conv))
    u = conv * (1.0 / (1.0 + jnp.exp(-conv)))
    x_dbl = jnp.einsum('bnd,de->bne', u, w_xp)
    dt_rank = w_dt.shape[0]
    d_state = a_log.shape[1]
    dt = jnp.einsum('bnr,rd->bnd', x_dbl[..., :dt_rank], w_dt) + b_dt
    dt = jnp.where(dt > 20.0, dt,
                   jnp.log(1.0 + jnp.exp(jnp.minimum(dt, 20.0))))
    Bm = x_dbl[..., dt_rank:dt_rank + d_state]
    Cm = x_dbl[..., dt_rank + d_state:]
    A = -jnp.exp(a_log)

    def scan_one(u_b, dt_b, B_b, C_b):
        def step(h, inp):
            dt_t, u_t, B_t, C_t = inp
            dA = jnp.exp(dt_t[:, None] * A)
            h = dA * h + (dt_t * u_t)[:, None] * B_t[None, :]
            return h, jnp.sum(h * C_t[None, :], axis=1)
        h0 = jnp.zeros((d_inner, d_state), jnp.float32)
        _, ys = lax.scan(step, h0, (dt_b, u_b, B_b, C_b))
        return ys

    ys = jax.vmap(scan_one)(u, dt, Bm, Cm)
    y = ys + u * d_p
    y = y * (z * (1.0 / (1.0 + jnp.exp(-z))))
    return jnp.einsum('bnd,dc->bnc', y, w_out)


if __name__ == "__main__":
    # MambaLayer defaults: d_state=64, d_conv=4, expand=2
    dim = 32
    d_state = 64
    d_conv = 4
    expand = 2
    d_inner = expand * dim
    dt_rank = math.ceil(dim / 16)
    B, N = 2, 8

    key = jax.random.PRNGKey(0)
    ks = jax.random.split(key, 8)

    ln_g = jnp.ones((1, dim), jnp.float32)
    ln_b = jnp.zeros((1, dim), jnp.float32)
    w_in = (jax.random.normal(ks[0], (dim, 2 * d_inner)) * 0.05).astype(jnp.float32)
    conv_w = (jax.random.normal(ks[1], (d_conv, d_inner)) * 0.2).astype(jnp.float32)
    conv_b = (jax.random.normal(ks[2], (1, d_inner)) * 0.1).astype(jnp.float32)
    w_xp = (jax.random.normal(ks[3], (d_inner, dt_rank + 2 * d_state)) * 0.05).astype(jnp.float32)
    w_dt = (jax.random.normal(ks[4], (dt_rank, d_inner)) * (dt_rank ** -0.5)).astype(jnp.float32)
    b_dt = jax.random.uniform(ks[5], (1, d_inner), jnp.float32,
                              minval=math.log(1e-3), maxval=math.log(1e-1))
    a_log = jnp.log(jnp.broadcast_to(
        jnp.arange(1, d_state + 1, dtype=jnp.float32), (d_inner, d_state)))
    d_p = jnp.ones((1, d_inner), jnp.float32)
    w_out = (jax.random.normal(ks[6], (d_inner, dim)) * 0.05).astype(jnp.float32)

    params = (ln_g, ln_b, w_in, conv_w, conv_b, w_xp, w_dt, b_dt, a_log, d_p,
              w_out)
    x = jax.random.normal(ks[7], (B, N, dim), jnp.float32)

    ref = jax.block_until_ready(mamba_layer_ref(x, params))

    # f32 matmul path: must match the PyTorch-equivalent reference tightly.
    out = jax.block_until_ready(mamba_layer(x, params))
    np.testing.assert_allclose(np.asarray(out), np.asarray(ref),
                               rtol=1e-3, atol=1e-3)

    # bf16 MXU-operand path (v6e / v7x production setting): looser tolerance.
    out_bf16 = jax.block_until_ready(
        mamba_layer(x, params, matmul_dtype=jnp.bfloat16))
    np.testing.assert_allclose(np.asarray(out_bf16), np.asarray(ref),
                               rtol=5e-2, atol=5e-2)

    print("KERNEL_OK")
</pallas_src>

<mosaic_0001>
module attributes {stable_mosaic.version = 11 : i64} {
  func.func @mamba_layer_kernel(%arg0: i32, %arg1: memref<1x8x32xf32, #tpu.memory_space<vmem>>, %arg2: memref<1x32xf32, #tpu.memory_space<vmem>>, %arg3: memref<1x32xf32, #tpu.memory_space<vmem>>, %arg4: memref<32x256xf32, #tpu.memory_space<vmem>>, %arg5: memref<4x64xf32, #tpu.memory_space<vmem>>, %arg6: memref<1x64xf32, #tpu.memory_space<vmem>>, %arg7: memref<64x384xf32, #tpu.memory_space<vmem>>, %arg8: memref<1x64xf32, #tpu.memory_space<vmem>>, %arg9: memref<64x64xf32, #tpu.memory_space<vmem>>, %arg10: memref<1x64xf32, #tpu.memory_space<vmem>>, %arg11: memref<64x32xf32, #tpu.memory_space<vmem>>, %arg12: memref<1x8x32xf32, #tpu.memory_space<vmem>>, %arg13: memref<8x64x64xf32, #tpu.memory_space<vmem>>, %arg14: memref<8x64x64xf32, #tpu.memory_space<vmem>>, %arg15: memref<8x64x64xf32, #tpu.memory_space<vmem>>, %arg16: memref<64x64xf32, #tpu.memory_space<vmem>>, %arg17: memref<8x64xf32, #tpu.memory_space<vmem>>) attributes {dimension_semantics = [#tpu.dimension_semantics<parallel>], iteration_bounds = array<i64: 2>, scalar_prefetch = 0 : i64, scratch_operands = 5 : i64, tpu.core_type = #tpu.core_type<tc>, window_params = [{transform_indices = @transform_0, window_bounds = array<i64: 1, 8, 32>}, {pipeline_mode = #tpu.pipeline_mode<synchronous>, transform_indices = @transform_1, window_bounds = array<i64: 1, 32>}, {pipeline_mode = #tpu.pipeline_mode<synchronous>, transform_indices = @transform_2, window_bounds = array<i64: 1, 32>}, {pipeline_mode = #tpu.pipeline_mode<synchronous>, transform_indices = @transform_3, window_bounds = array<i64: 32, 256>}, {pipeline_mode = #tpu.pipeline_mode<synchronous>, transform_indices = @transform_4, window_bounds = array<i64: 4, 64>}, {pipeline_mode = #tpu.pipeline_mode<synchronous>, transform_indices = @transform_5, window_bounds = array<i64: 1, 64>}, {pipeline_mode = #tpu.pipeline_mode<synchronous>, transform_indices = @transform_6, window_bounds = array<i64: 64, 384>}, {pipeline_mode = #tpu.pipeline_mode<synchronous>, transform_indices = @transform_7, window_bounds = array<i64: 1, 64>}, {pipeline_mode = #tpu.pipeline_mode<synchronous>, transform_indices = @transform_8, window_bounds = array<i64: 64, 64>}, {pipeline_mode = #tpu.pipeline_mode<synchronous>, transform_indices = @transform_9, window_bounds = array<i64: 1, 64>}, {pipeline_mode = #tpu.pipeline_mode<synchronous>, transform_indices = @transform_10, window_bounds = array<i64: 64, 32>}, {transform_indices = @transform_11, window_bounds = array<i64: 1, 8, 32>}]} {
    %c0 = arith.constant 0 : index
    %c0_0 = arith.constant 0 : index
    %c0_1 = arith.constant 0 : index
    %0 = vector.load %arg1[%c0, %c0_0, %c0_1] : memref<1x8x32xf32, #tpu.memory_space<vmem>>, vector<1x8x32xf32>
    %1 = vector.shape_cast %0 : vector<1x8x32xf32> to vector<8x32xf32>
    %cst = arith.constant dense<0.000000e+00> : vector<8xf32>
    %2 = vector.multi_reduction <add>, %1, %cst [1] : vector<8x32xf32> to vector<8xf32>
    %3 = vector.shape_cast %2 : vector<8xf32> to vector<8x1xf32>
    %cst_2 = arith.constant 3.200000e+01 : f32
    %4 = vector.broadcast %cst_2 : f32 to vector<8x1xf32>
    %5 = arith.divf %3, %4 : vector<8x1xf32>
    %6 = vector.broadcast %5 : vector<8x1xf32> to vector<8x32xf32>
    %7 = arith.subf %1, %6 : vector<8x32xf32>
    %8 = arith.mulf %7, %7 : vector<8x32xf32>
    %cst_3 = arith.constant dense<0.000000e+00> : vector<8xf32>
    %9 = vector.multi_reduction <add>, %8, %cst_3 [1] : vector<8x32xf32> to vector<8xf32>
    %10 = vector.shape_cast %9 : vector<8xf32> to vector<8x1xf32>
    %cst_4 = arith.constant 3.200000e+01 : f32
    %11 = vector.broadcast %cst_4 : f32 to vector<8x1xf32>
    %12 = arith.divf %10, %11 : vector<8x1xf32>
    %13 = vector.broadcast %5 : vector<8x1xf32> to vector<8x32xf32>
    %14 = arith.subf %1, %13 : vector<8x32xf32>
    %cst_5 = arith.constant 9.99999974E-6 : f32
    %15 = vector.broadcast %cst_5 : f32 to vector<8x1xf32>
    %16 = arith.addf %12, %15 : vector<8x1xf32>
    %17 = math.rsqrt %16 : vector<8x1xf32>
    %18 = vector.broadcast %17 : vector<8x1xf32> to vector<8x32xf32>
    %19 = arith.mulf %14, %18 : vector<8x32xf32>
    %c0_6 = arith.constant 0 : index
    %c0_7 = arith.constant 0 : index
    %20 = vector.load %arg2[%c0_6, %c0_7] : memref<1x32xf32, #tpu.memory_space<vmem>>, vector<1x32xf32>
    %21 = vector.broadcast %20 : vector<1x32xf32> to vector<8x32xf32>
    %22 = arith.mulf %19, %21 : vector<8x32xf32>
    %c0_8 = arith.constant 0 : index
    %c0_9 = arith.constant 0 : index
    %23 = vector.load %arg3[%c0_8, %c0_9] : memref<1x32xf32, #tpu.memory_space<vmem>>, vector<1x32xf32>
    %24 = vector.broadcast %23 : vector<1x32xf32> to vector<8x32xf32>
    %25 = arith.addf %22, %24 : vector<8x32xf32>
    %c0_10 = arith.constant 0 : index
    %c0_11 = arith.constant 0 : index
    %26 = vector.load %arg4[%c0_10, %c0_11] : memref<32x256xf32, #tpu.memory_space<vmem>>, vector<32x256xf32>
    %cst_12 = arith.constant dense<0.000000e+00> : vector<8x256xf32>
    %27 = tpu.matmul %25, %26, %cst_12 {dimension_numbers = #tpu.dot_dimension_numbers<[1], [0], [0], [1], [0, 0, 1, 1], [], []>} : vector<8x32xf32>, vector<32x256xf32>, vector<8x256xf32> -> vector<8x256xf32>
    %28 = vector.extract_strided_slice %27 {offsets = [0, 0], sizes = [8, 64], strides = [1, 1]} : vector<8x256xf32> to vector<8x64xf32>
    %29 = vector.extract_strided_slice %27 {offsets = [0, 128], sizes = [8, 64], strides = [1, 1]} : vector<8x256xf32> to vector<8x64xf32>
    %c0_13 = arith.constant 0 : index
    %c0_14 = arith.constant 0 : index
    %30 = vector.load %arg5[%c0_13, %c0_14] : memref<4x64xf32, #tpu.memory_space<vmem>>, vector<4x64xf32>
    %cst_15 = arith.constant 0.000000e+00 : f32
    %31 = vector.broadcast %cst_15 : f32 to vector<3x64xf32>
    %32 = tpu.concatenate %31, %28 in 0 : vector<3x64xf32>, vector<8x64xf32> -> vector<11x64xf32>
    %cst_16 = arith.constant 0.000000e+00 : f32
    %33 = vector.broadcast %cst_16 : f32 to vector<8x64xf32>
    %c0_17 = arith.constant 0 : index
    %c0_18 = arith.constant 0 : index
    %34 = vector.load %arg6[%c0_17, %c0_18] : memref<1x64xf32, #tpu.memory_space<vmem>>, vector<1x64xf32>
    %35 = vector.broadcast %34 : vector<1x64xf32> to vector<8x64xf32>
    %36 = arith.addf %33, %35 : vector<8x64xf32>
    %37 = vector.extract_strided_slice %32 {offsets = [0, 0], sizes = [8, 64], strides = [1, 1]} : vector<11x64xf32> to vector<8x64xf32>
    %38 = vector.extract_strided_slice %30 {offsets = [0, 0], sizes = [1, 64], strides = [1, 1]} : vector<4x64xf32> to vector<1x64xf32>
    %39 = vector.broadcast %38 : vector<1x64xf32> to vector<8x64xf32>
    %40 = arith.mulf %37, %39 : vector<8x64xf32>
    %41 = arith.addf %36, %40 : vector<8x64xf32>
    %42 = vector.extract_strided_slice %32 {offsets = [1, 0], sizes = [8, 64], strides = [1, 1]} : vector<11x64xf32> to vector<8x64xf32>
    %43 = vector.extract_strided_slice %30 {offsets = [1, 0], sizes = [1, 64], strides = [1, 1]} : vector<4x64xf32> to vector<1x64xf32>
    %44 = vector.broadcast %43 : vector<1x64xf32> to vector<8x64xf32>
    %45 = arith.mulf %42, %44 : vector<8x64xf32>
    %46 = arith.addf %41, %45 : vector<8x64xf32>
    %47 = vector.extract_strided_slice %32 {offsets = [2, 0], sizes = [8, 64], strides = [1, 1]} : vector<11x64xf32> to vector<8x64xf32>
    %48 = vector.extract_strided_slice %30 {offsets = [2, 0], sizes = [1, 64], strides = [1, 1]} : vector<4x64xf32> to vector<1x64xf32>
    %49 = vector.broadcast %48 : vector<1x64xf32> to vector<8x64xf32>
    %50 = arith.mulf %47, %49 : vector<8x64xf32>
    %51 = arith.addf %46, %50 : vector<8x64xf32>
    %52 = vector.extract_strided_slice %32 {offsets = [3, 0], sizes = [8, 64], strides = [1, 1]} : vector<11x64xf32> to vector<8x64xf32>
    %53 = vector.extract_strided_slice %30 {offsets = [3, 0], sizes = [1, 64], strides = [1, 1]} : vector<4x64xf32> to vector<1x64xf32>
    %54 = vector.broadcast %53 : vector<1x64xf32> to vector<8x64xf32>
    %55 = arith.mulf %52, %54 : vector<8x64xf32>
    %56 = arith.addf %51, %55 : vector<8x64xf32>
    %cst_19 = arith.constant 0.000000e+00 : f32
    %57 = vector.broadcast %cst_19 : f32 to vector<8x64xf32>
    %58 = arith.subf %57, %56 : vector<8x64xf32>
    %59 = math.exp %58 : vector<8x64xf32>
    %cst_20 = arith.constant 1.000000e+00 : f32
    %60 = vector.broadcast %cst_20 : f32 to vector<8x64xf32>
    %61 = arith.addf %60, %59 : vector<8x64xf32>
    %62 = tpu.reciprocal %61 {approx = true} : vector<8x64xf32> -> vector<8x64xf32>
    %63 = arith.mulf %56, %62 : vector<8x64xf32>
    %c0_21 = arith.constant 0 : index
    %c0_22 = arith.constant 0 : index
    %64 = vector.load %arg7[%c0_21, %c0_22] : memref<64x384xf32, #tpu.memory_space<vmem>>, vector<64x384xf32>
    %cst_23 = arith.constant dense<0.000000e+00> : vector<8x384xf32>
    %65 = tpu.matmul %63, %64, %cst_23 {dimension_numbers = #tpu.dot_dimension_numbers<[1], [0], [0], [1], [0, 0, 1, 1], [], []>} : vector<8x64xf32>, vector<64x384xf32>, vector<8x384xf32> -> vector<8x384xf32>
    %66 = vector.extract_strided_slice %65 {offsets = [0, 0], sizes = [8, 64], strides = [1, 1]} : vector<8x384xf32> to vector<8x64xf32>
    %c0_24 = arith.constant 0 : index
    %c0_25 = arith.constant 0 : index
    %67 = vector.load %arg8[%c0_24, %c0_25] : memref<1x64xf32, #tpu.memory_space<vmem>>, vector<1x64xf32>
    %68 = vector.broadcast %67 : vector<1x64xf32> to vector<8x64xf32>
    %69 = arith.addf %66, %68 : vector<8x64xf32>
    %cst_26 = arith.constant 2.000000e+01 : f32
    %70 = vector.broadcast %cst_26 : f32 to vector<8x64xf32>
    %71 = arith.cmpf ogt, %69, %70 : vector<8x64xf32>
    %cst_27 = arith.constant 2.000000e+01 : f32
    %72 = vector.broadcast %cst_27 : f32 to vector<8x64xf32>
    %73 = arith.minimumf %69, %72 : vector<8x64xf32>
    %74 = math.exp %73 : vector<8x64xf32>
    %cst_28 = arith.constant 1.000000e+00 : f32
    %75 = vector.broadcast %cst_28 : f32 to vector<8x64xf32>
    %76 = arith.addf %75, %74 : vector<8x64xf32>
    %77 = math.log %76 : vector<8x64xf32>
    %78 = arith.select %71, %69, %77 : vector<8x64xi1>, vector<8x64xf32>
    %79 = vector.extract_strided_slice %65 {offsets = [0, 128], sizes = [8, 64], strides = [1, 1]} : vector<8x384xf32> to vector<8x64xf32>
    %80 = vector.extract_strided_slice %65 {offsets = [0, 256], sizes = [8, 64], strides = [1, 1]} : vector<8x384xf32> to vector<8x64xf32>
    %c0_29 = arith.constant 0 : index
    %c0_30 = arith.constant 0 : index
    %81 = vector.load %arg9[%c0_29, %c0_30] : memref<64x64xf32, #tpu.memory_space<vmem>>, vector<64x64xf32>
    %82 = arith.mulf %78, %63 : vector<8x64xf32>
    %cst_31 = arith.constant 0.000000e+00 : f32
    %83 = vector.broadcast %cst_31 : f32 to vector<64x64xf32>
    %c0_32 = arith.constant 0 : index
    %c0_33 = arith.constant 0 : index
    %84 = vector.load %arg16[%c0_32, %c0_33] : memref<64x64xf32, #tpu.memory_space<vmem>>, vector<64x64xf32>
    tpu.vector_store %arg16[%c0_32, %c0_33], %83 {strides = array<i32>} : memref<64x64xf32, #tpu.memory_space<vmem>>, vector<64x64xf32>,
    %85 = vector.shape_cast %78 : vector<8x64xf32> to vector<8x1x64xf32>
    %86 = vector.shape_cast %81 : vector<64x64xf32> to vector<1x64x64xf32>
    %87 = vector.broadcast %85 : vector<8x1x64xf32> to vector<8x64x64xf32>
    %88 = vector.broadcast %86 : vector<1x64x64xf32> to vector<8x64x64xf32>
    %89 = arith.mulf %87, %88 : vector<8x64x64xf32>
    %90 = math.exp %89 : vector<8x64x64xf32>
    %c0_34 = arith.constant 0 : index
    %c0_35 = arith.constant 0 : index
    %c0_36 = arith.constant 0 : index
    %91 = vector.load %arg13[%c0_34, %c0_35, %c0_36] : memref<8x64x64xf32, #tpu.memory_space<vmem>>, vector<8x64x64xf32>
    tpu.vector_store %arg13[%c0_34, %c0_35, %c0_36], %90 {strides = array<i32>} : memref<8x64x64xf32, #tpu.memory_space<vmem>>, vector<8x64x64xf32>,
    %92 = vector.shape_cast %79 : vector<8x64xf32> to vector<8x64x1xf32>
    %93 = vector.shape_cast %82 : vector<8x64xf32> to vector<8x1x64xf32>
    %94 = vector.broadcast %92 : vector<8x64x1xf32> to vector<8x64x64xf32>
    %95 = vector.broadcast %93 : vector<8x1x64xf32> to vector<8x64x64xf32>
    %96 = arith.mulf %94, %95 : vector<8x64x64xf32>
    %c0_37 = arith.constant 0 : index
    %c0_38 = arith.constant 0 : index
    %c0_39 = arith.constant 0 : index
    %97 = vector.load %arg14[%c0_37, %c0_38, %c0_39] : memref<8x64x64xf32, #tpu.memory_space<vmem>>, vector<8x64x64xf32>
    tpu.vector_store %arg14[%c0_37, %c0_38, %c0_39], %96 {strides = array<i32>} : memref<8x64x64xf32, #tpu.memory_space<vmem>>, vector<8x64x64xf32>,
    %98 = vector.shape_cast %80 : vector<8x64xf32> to vector<8x64x1xf32>
    %99 = vector.shape_cast %98 : vector<8x64x1xf32> to vector<8x64x1xf32>
    %100 = vector.broadcast %99 : vector<8x64x1xf32> to vector<8x64x64xf32>
    %c0_40 = arith.constant 0 : index
    %c0_41 = arith.constant 0 : index
    %c0_42 = arith.constant 0 : index
    %101 = vector.load %arg15[%c0_40, %c0_41, %c0_42] : memref<8x64x64xf32, #tpu.memory_space<vmem>>, vector<8x64x64xf32>
    tpu.vector_store %arg15[%c0_40, %c0_41, %c0_42], %100 {strides = array<i32>} : memref<8x64x64xf32, #tpu.memory_space<vmem>>, vector<8x64x64xf32>,
    %c0_i32 = arith.constant 0 : i32
    %c8_i32 = arith.constant 8 : i32
    %102 = arith.addi %c0_i32, %c8_i32 : i32
    %c1_i32 = arith.constant 1 : i32
    scf.for %arg18 = %c0_i32 to %102 step %c1_i32  : i32 {
      %c1_i32_56 = arith.constant 1 : i32
      %121 = arith.muli %arg18, %c1_i32_56 : i32
      %c0_i32_57 = arith.constant 0 : i32
      %122 = arith.addi %c0_i32_57, %121 : i32
      %123 = arith.index_cast %122 : i32 to index
      %c0_58 = arith.constant 0 : index
      %c0_59 = arith.constant 0 : index
      %124 = vector.load %arg13[%123, %c0_58, %c0_59] : memref<8x64x64xf32, #tpu.memory_space<vmem>>, vector<1x64x64xf32>
      %125 = vector.shape_cast %124 : vector<1x64x64xf32> to vector<64x64xf32>
      %c0_60 = arith.constant 0 : index
      %c0_61 = arith.constant 0 : index
      %126 = vector.load %arg16[%c0_60, %c0_61] : memref<64x64xf32, #tpu.memory_space<vmem>>, vector<64x64xf32>
      %127 = arith.mulf %125, %126 : vector<64x64xf32>
      %128 = arith.index_cast %122 : i32 to index
      %c0_62 = arith.constant 0 : index
      %c0_63 = arith.constant 0 : index
      %129 = vector.load %arg14[%128, %c0_62, %c0_63] : memref<8x64x64xf32, #tpu.memory_space<vmem>>, vector<1x64x64xf32>
      %130 = vector.shape_cast %129 : vector<1x64x64xf32> to vector<64x64xf32>
      %131 = arith.addf %127, %130 : vector<64x64xf32>
      %c0_64 = arith.constant 0 : index
      %c0_65 = arith.constant 0 : index
      %132 = vector.load %arg16[%c0_64, %c0_65] : memref<64x64xf32, #tpu.memory_space<vmem>>, vector<64x64xf32>
      tpu.vector_store %arg16[%c0_64, %c0_65], %131 {strides = array<i32>} : memref<64x64xf32, #tpu.memory_space<vmem>>, vector<64x64xf32>,
      %133 = arith.index_cast %122 : i32 to index
      %c0_66 = arith.constant 0 : index
      %c0_67 = arith.constant 0 : index
      %134 = vector.load %arg15[%133, %c0_66, %c0_67] : memref<8x64x64xf32, #tpu.memory_space<vmem>>, vector<1x64x64xf32>
      %135 = vector.shape_cast %134 : vector<1x64x64xf32> to vector<64x64xf32>
      %136 = arith.mulf %131, %135 : vector<64x64xf32>
      %cst_68 = arith.constant dense<0.000000e+00> : vector<64xf32>
      %137 = vector.multi_reduction <add>, %136, %cst_68 [0] : vector<64x64xf32> to vector<64xf32>
      %138 = vector.shape_cast %137 : vector<64xf32> to vector<1x64xf32>
      %c0_i32_69 = arith.constant 0 : i32
      %139 = arith.addi %c0_i32_69, %122 : i32
      %140 = arith.index_cast %139 : i32 to index
      %c0_70 = arith.constant 0 : index
      %141 = vector.load %arg17[%140, %c0_70] : memref<8x64xf32, #tpu.memory_space<vmem>>, vector<1x64xf32>
      tpu.vector_store %arg17[%140, %c0_70], %138 {strides = array<i32>} : memref<8x64xf32, #tpu.memory_space<vmem>>, vector<1x64xf32>,
    }
    %c8_i32_43 = arith.constant 8 : i32
    %c0_44 = arith.constant 0 : index
    %c0_45 = arith.constant 0 : index
    %103 = vector.load %arg17[%c0_44, %c0_45] : memref<8x64xf32, #tpu.memory_space<vmem>>, vector<8x64xf32>
    %c0_46 = arith.constant 0 : index
    %c0_47 = arith.constant 0 : index
    %104 = vector.load %arg10[%c0_46, %c0_47] : memref<1x64xf32, #tpu.memory_space<vmem>>, vector<1x64xf32>
    %105 = vector.broadcast %104 : vector<1x64xf32> to vector<8x64xf32>
    %106 = arith.mulf %63, %105 : vector<8x64xf32>
    %107 = arith.addf %103, %106 : vector<8x64xf32>
    %cst_48 = arith.constant 0.000000e+00 : f32
    %108 = vector.broadcast %cst_48 : f32 to vector<8x64xf32>
    %109 = arith.subf %108, %29 : vector<8x64xf32>
    %110 = math.exp %109 : vector<8x64xf32>
    %cst_49 = arith.constant 1.000000e+00 : f32
    %111 = vector.broadcast %cst_49 : f32 to vector<8x64xf32>
    %112 = arith.addf %111, %110 : vector<8x64xf32>
    %113 = tpu.reciprocal %112 {approx = true} : vector<8x64xf32> -> vector<8x64xf32>
    %114 = arith.mulf %29, %113 : vector<8x64xf32>
    %115 = arith.mulf %107, %114 : vector<8x64xf32>
    %c0_50 = arith.constant 0 : index
    %c0_51 = arith.constant 0 : index
    %116 = vector.load %arg11[%c0_50, %c0_51] : memref<64x32xf32, #tpu.memory_space<vmem>>, vector<64x32xf32>
    %cst_52 = arith.constant dense<0.000000e+00> : vector<8x32xf32>
    %117 = tpu.matmul %115, %116, %cst_52 {dimension_numbers = #tpu.dot_dimension_numbers<[1], [0], [0], [1], [0, 0, 1, 1], [], []>} : vector<8x64xf32>, vector<64x32xf32>, vector<8x32xf32> -> vector<8x32xf32>
    %c0_53 = arith.constant 0 : index
    %c0_54 = arith.constant 0 : index
    %c0_55 = arith.constant 0 : index
    %118 = vector.load %arg12[%c0_53, %c0_54, %c0_55] : memref<1x8x32xf32, #tpu.memory_space<vmem>>, vector<1x8x32xf32>
    %119 = vector.shape_cast %118 : vector<1x8x32xf32> to vector<8x32xf32>
    %120 = vector.shape_cast %117 : vector<8x32xf32> to vector<1x8x32xf32>
    tpu.vector_store %arg12[%c0_53, %c0_54, %c0_55], %120 {strides = array<i32>} : memref<1x8x32xf32, #tpu.memory_space<vmem>>, vector<1x8x32xf32>,
    return
  }
  func.func @transform_0(%arg0: i32) -> (i32, i32, i32) {
    %c0_i32 = arith.constant 0 : i32
    %c0_i32_0 = arith.constant 0 : i32
    %c0_i32_1 = arith.constant 0 : i32
    return %arg0, %c0_i32, %c0_i32_0 : i32, i32, i32
  }
  func.func @transform_1(%arg0: i32) -> (i32, i32) {
    %c0_i32 = arith.constant 0 : i32
    %c0_i32_0 = arith.constant 0 : i32
    %c0_i32_1 = arith.constant 0 : i32
    return %c0_i32, %c0_i32_0 : i32, i32
  }
  func.func @transform_2(%arg0: i32) -> (i32, i32) {
    %c0_i32 = arith.constant 0 : i32
    %c0_i32_0 = arith.constant 0 : i32
    %c0_i32_1 = arith.constant 0 : i32
    return %c0_i32, %c0_i32_0 : i32, i32
  }
  func.func @transform_3(%arg0: i32) -> (i32, i32) {
    %c0_i32 = arith.constant 0 : i32
    %c0_i32_0 = arith.constant 0 : i32
    %c0_i32_1 = arith.constant 0 : i32
    return %c0_i32, %c0_i32_0 : i32, i32
  }
  func.func @transform_4(%arg0: i32) -> (i32, i32) {
    %c0_i32 = arith.constant 0 : i32
    %c0_i32_0 = arith.constant 0 : i32
    %c0_i32_1 = arith.constant 0 : i32
    return %c0_i32, %c0_i32_0 : i32, i32
  }
  func.func @transform_5(%arg0: i32) -> (i32, i32) {
    %c0_i32 = arith.constant 0 : i32
    %c0_i32_0 = arith.constant 0 : i32
    %c0_i32_1 = arith.constant 0 : i32
    return %c0_i32, %c0_i32_0 : i32, i32
  }
  func.func @transform_6(%arg0: i32) -> (i32, i32) {
    %c0_i32 = arith.constant 0 : i32
    %c0_i32_0 = arith.constant 0 : i32
    %c0_i32_1 = arith.constant 0 : i32
    return %c0_i32, %c0_i32_0 : i32, i32
  }
  func.func @transform_7(%arg0: i32) -> (i32, i32) {
    %c0_i32 = arith.constant 0 : i32
    %c0_i32_0 = arith.constant 0 : i32
    %c0_i32_1 = arith.constant 0 : i32
    return %c0_i32, %c0_i32_0 : i32, i32
  }
  func.func @transform_8(%arg0: i32) -> (i32, i32) {
    %c0_i32 = arith.constant 0 : i32
    %c0_i32_0 = arith.constant 0 : i32
    %c0_i32_1 = arith.constant 0 : i32
    return %c0_i32, %c0_i32_0 : i32, i32
  }
  func.func @transform_9(%arg0: i32) -> (i32, i32) {
    %c0_i32 = arith.constant 0 : i32
    %c0_i32_0 = arith.constant 0 : i32
    %c0_i32_1 = arith.constant 0 : i32
    return %c0_i32, %c0_i32_0 : i32, i32
  }
  func.func @transform_10(%arg0: i32) -> (i32, i32) {
    %c0_i32 = arith.constant 0 : i32
    %c0_i32_0 = arith.constant 0 : i32
    %c0_i32_1 = arith.constant 0 : i32
    return %c0_i32, %c0_i32_0 : i32, i32
  }
  func.func @transform_11(%arg0: i32) -> (i32, i32, i32) {
    %c0_i32 = arith.constant 0 : i32
    %c0_i32_0 = arith.constant 0 : i32
    %c0_i32_1 = arith.constant 0 : i32
    return %arg0, %c0_i32, %c0_i32_0 : i32, i32, i32
  }
}

</mosaic_0001>

<bundles_post_ra>
// kernel: tpu_custom_call.1
= control target key start
LH: loop header
LB: loop body
LE: loop exit
PB: predicated region body
PF: predicated region fallthrough
CT: control target
= control target key end

     0   :  { %16 = vsyncpa [#allocation8], 0  ;;  %s3693_s0 = inlined_call_operand.vmem [shape: f32[2,8,32], index: 0, kind: input, shape index: {}]   ;;  %s3694_s1 = inlined_call_operand.vmem [shape: f32[1,32], index: 1, kind: input, shape index: {}]   ;;  %s3695_s2 = inlined_call_operand.vmem [shape: f32[1,32], index: 2, kind: input, shape index: {}]   ;;  %s3696_s3 = inlined_call_operand.vmem [shape: f32[32,256], index: 3, kind: input, shape index: {}]   ;;  %s3697_s4 = inlined_call_operand.vmem [shape: f32[4,64], index: 4, kind: input, shape index: {}]   ;;  %s3698_s5 = inlined_call_operand.vmem [shape: f32[1,64], index: 5, kind: input, shape index: {}]   ;;  %s3699_s6 = inlined_call_operand.hbm [shape: f32[64,384], index: 6, kind: input, shape index: {}]   ;;  %s3700_s7 = inlined_call_operand.vmem [shape: f32[1,64], index: 7, kind: input, shape index: {}]   ;;  %s3701_s8 = inlined_call_operand.hbm [shape: f32[64,64], index: 8, kind: input, shape index: {}]   ;;  %s3702_s9 = inlined_call_operand.vmem [shape: f32[1,64], index: 9, kind: input, shape index: {}]   ;;  %s3703_s10 = inlined_call_operand.vmem [shape: f32[64,32], index: 10, kind: input, shape index: {}]   ;;  %s3704_s11 = inlined_call_operand.hbm [shape: f32[2,8,32], index: 11, kind: output, shape index: {}]  }
   0x1   :  { %17 = vsyncpa [#allocation11], 0 }
   0x2   :  { %18 = vsyncpa [#allocation9], 0 }
   0x3   :  { %20 = vsyncpa [#allocation9 + $0x1], 0  ;;  %s2785_s17 = smov 0   ;;  %s2787_s18 = smov 0  }
   0x4   :  { %s2789_s19 = smov 0   ;;  %s2791_s20 = smov 0  }
   0x5 LB: > { %3709 = sst [smem:[#allocation16_spill]] %s2705_s19  ;;  %s2806_s21 = sadd.s32 4294967295, %s2709_s20   ;;  %s2709_s20 = sphi %s2791_s20, %s3721_s20   ;;  %s2705_s19 = sphi %s2789_s19, %s3723_s19   ;;  %s2701_s18 = sphi %s2787_s18, %s3725_s18   ;;  %s2697_s17 = sphi %s2785_s17, %s3724_s17  }
   0x6   : > { %s2288_s22 = sadd.s32 4294967294, %s2709_s20   ;;  %s2810_s23 = sadd.s32 1, %s2709_s20  }
   0x7   : > { %3710 = sst [smem:[#allocation17_spill]] %s2810_s23  ;;  %s269_s24 = sadd.s32 1, %s2705_s19 }
   0x8   : > { %s266_s25 = ssub.s32 %s2709_s20, %s2810_s23  ;;  %p279_p0 = scmp.ne.s32.totalorder %s2705_s19, %s2701_s18 }
   0x9   : > { %p267_p1 = scmp.eq.s32.totalorder %s266_s25, 0  ;;  %p280_p2 = scmp.eq.s32.totalorder %s2806_s21, 1 }
   0xa   : > { %p285_p3 = scmp.ne.s32.totalorder %s2701_s18, %s2697_s17  ;;  %p286_p4 = scmp.eq.s32.totalorder %s2288_s22, 1 }
   0xb   : > { %s2821_s26 = scalar_select %p267_p1, %s2705_s19, %s269_s24  }
   0xc   : > { %p2823_p5 = por %p280_p2, %p279_p0  ;;  %p2827_p6 = por %p286_p4, %p285_p3 }
   0xd   : > { %3711 = sst [smem:[#allocation18_spill]] %s2821_s26  ;;  %p2289_p7 = scmp.ge.s32.totalorder %s2709_s20, 1 }
   0xe   : > { %s3713_s28 = scalar_select %p2827_p6, 1, 0 }
   0xf   : > { %p293_p8 = scmp.lt.s32.totalorder %s2709_s20, 3  ;;  %p3705_p9 = scmp.eq.s32.totalorder %s2806_s21, 0 }
  0x10   : > { %s2715_s30 = smov [#allocation7]   ;;  %s2716_s14 = smov [#allocation10]  }
  0x11   : > { %p2834_p10 = pnand %p2289_p7, %p293_p8  ;;  %s320_s12 = sshll.u32 %s2715_s30, 4  ;;  %s321_s12 = int_to_ptr.vmem [resolvable:$true] %s320_s12 }
  0x12   : > { %s336_s15 = sshll.u32 %s2716_s14, 4  ;;  %s2596_s16 = scalar_lea.vmem %s321_s12, 3072  ;;  %s337_s15 = int_to_ptr.vmem [resolvable:$true] %s336_s15 }
  0x13   : > { %p2378_p11 = pneg %p2834_p10  ;;  %p2597_p0 = scmp.ne.s32.totalorder %s321_s12, %s2596_s16 }
  0x14   : > { %p2604_p3 = scmp.lt.s32.totalorder %s321_s12, %s321_s12  ;;  %p2605_p4 = scmp.lt.s32.totalorder %s2596_s16, %s2596_s16 }
  0x15   : > { %p2842_p12 = pnand %p3705_p9, %p2378_p11 }
  0x16   : > { %p2606_p7 = por %p2605_p4, %p2604_p3 }
  0x17   : > { %p2587_p13 = pneg %p2842_p12 }
  0x19   : > { %p2599_p1 = pnand %p2597_p0, %p2587_p13 }
  0x1b   : > { %p2600_p2 = pneg %p2599_p1 }
  0x1d   : > { %p2607_p8 = pnand %p2606_p7, %p2600_p2 }
  0x1f   : > { %2610 = shalt.err (!%p2607_p8)
}
  0x20   : > { %s2717_s22 = smov 384   ;;  %s2718_s24 = smov 24  }
  0x21   : > { %2381 = dma.hbm_to_vmem [thread:$0]  (!%p2842_p12), %s3699_s6, 3072, %s321_s12, [#allocation8], %s2717_s22, %s2717_s22, %s2718_s24  }
  0x22   : > { %s2622_s14 = scalar_lea.vmem %s337_s15, 1024  ;;  %p2630_p9 = scmp.lt.s32.totalorder %s337_s15, %s337_s15 }
  0x23   : > { %p2623_p11 = scmp.ne.s32.totalorder %s337_s15, %s2622_s14  ;;  %p2631_p6 = scmp.lt.s32.totalorder %s2622_s14, %s2622_s14 }
  0x25   : > { %p2625_p0 = pnand %p2623_p11, %p2587_p13  ;;  %p2632_p3 = por %p2631_p6, %p2630_p9 }
  0x27   : > { %p2626_p1 = pneg %p2625_p0 }
  0x29   : > { %p2633_p2 = pnand %p2632_p3, %p2626_p1 }
  0x2b   : > { %2636 = shalt.err (!%p2633_p2)
}
  0x2c   : > { %s2719_s16 = smov 128   ;;  %s2720_s26 = smov 8  }
  0x2d   : > { %2384 = dma.hbm_to_vmem [thread:$0]  (!%p2842_p12), %s3701_s8, 1024, %s337_s15, [#allocation11], %s2719_s16, %s2719_s16, %s2720_s26  }
  0x2e   : > { %365 = sbr.rel (%p2834_p10) target bundleno = 1444 (0x5a4), region = 64  ;;  %p3716_p4 = scmp.eq.s32.totalorder (!%p2834_p10), %s2806_s21, 0 }
  0x33   : > { %2684 = dma.done.wait (%p3716_p4), [#allocation8], 3072   ;;  %p3717_p13 = pmov %p3716_p4 }
  0x34   : > { %p3718_p6 = pmov %p3716_p4 }
  0x35   : > { %2686 = vsyncadd (%p3717_p13), [#allocation8], 4294964224 }
  0x36   : > { %2688 = dma.done.wait (%p3718_p6), [#allocation11], 1024   ;;  %p3719_p9 = pmov %p3716_p4 }
  0x37   : > { %p408_p7 = scmp.lt.s32.totalorder %s2806_s21, 1  ;;  %vm413_vm0 = vcmask 261120   ;;  %s405_s13 = sand.u32 1, %s2701_s18   ;;  %v451_v7 = vld [vmem:[%s3696_s3 + $0x38] sm:$0xff]  ;;  %v450_v8 = vld [vmem:[%s3696_s3 + $0x30] sm:$0xff]  ;;  %v449_v9 = vld [vmem:[%s3696_s3 + $0x28] sm:$0xff]  ;;  %v540_v49 = vlaneseq }
  0x38   : > { %2690 = vsyncadd (%p3719_p9), [#allocation11], 4294966272  ;;  %vm618_vm1 = vcmask 523264   ;;  %s2893_s16 = sshll.u32 %s405_s13, 3  ;;  %479 = vmatprep.subr.mxu0 %v451_v7  ;;  %v448_v10 = vld [vmem:[%s3696_s3 + $0x20] sm:$0xff]  ;;  %v2721_v11 = vmov 0.0  }
  0x39   : > { %s409_s19 = scalar_select %p408_p7, %s2806_s21, 1  ;;  %519 = vmatprep.mubr.f32.mxu0 %v2721_v11  ;;  %788 = vst.msk [vmem:[#allocation5] sm:$0xff] %vm618_vm1, %v2721_v11  ;;  %789 = vst.msk [vmem:[#allocation5 + $0x8] sm:$0xff] %vm618_vm1, %v2721_v11  ;;  %480 = vmatpush1.msra.mxu0 %v450_v8  ;;  %v447_v12 = vld [vmem:[%s3696_s3 + $0x18] sm:$0xff]  ;;  %v446_v13 = vld [vmem:[%s3696_s3 + $0x10] sm:$0xff]  ;;  %vm2722_vm2 = vmmov 0  }
  0x3a   : > { %790 = vst.msk [vmem:[#allocation5 + $0x10] sm:$0xff] %vm618_vm1, %v2721_v11  ;;  %791 = vst.msk [vmem:[#allocation5 + $0x18] sm:$0xff] %vm618_vm1, %v2721_v11  ;;  %686 = vmatprep.mubr.f32.mxu1 %v2721_v11  ;;  %481 = vmatprep.subr.mxu0 %v449_v9  ;;  %v445_v14 = vld [vmem:[%s3696_s3 + $0x8] sm:$0xff]  ;;  %v444_v15 = vld [vmem:[%s3696_s3] sm:$0xff]  ;;  %v2945_v50 = vshrl.u32 %v540_v49, 7  ;;  %vm530_vm3 = vcmask 1042432  }
  0x3b   : > { %s2297_s23 = sshll.u32 %s409_s19, 3  ;;  %792 = vst.msk [vmem:[#allocation5 + $0x20] sm:$0xff] %vm618_vm1, %v2721_v11  ;;  %793 = vst.msk [vmem:[#allocation5 + $0x28] sm:$0xff] %vm618_vm1, %v2721_v11  ;;  %482 = vmatpush1.msra.mxu0 %v448_v10  ;;  %v2298_v20 = vld [vmem:[%s3694_s1] ss:$0 sm:$0xff]  ;;  %v616_v25 = vld [vmem:[#allocation7 + $0xb0] sm:$0xff] }
  0x3c   : > { %s411_s12 = scalar_lea.vmem %s3693_s0, %s2297_s23  ;;  %794 = vst.msk [vmem:[#allocation5 + $0x30] sm:$0xff] %vm618_vm1, %v2721_v11  ;;  %795 = vst.msk [vmem:[#allocation5 + $0x38] sm:$0xff] %vm618_vm1, %v2721_v11  ;;  %483 = vmatprep.subr.mxu0 %v447_v12  ;;  %v2299_v22 = vld [vmem:[%s3695_s2] ss:$0 sm:$0xff]  ;;  %v615_v26 = vld [vmem:[#allocation7 + $0xa8] sm:$0xff]  ;;  %638 = vmatprep.subr.mxu1 %v616_v25  ;;  %v2948_v51 = vsub.s32 1, %v2945_v50 }
  0x3d   : > { %v412_v0 = vld [vmem:[%s411_s12] sm:$0xff]  ;;  %484 = vmatpush1.msra.mxu0 %v446_v13  ;;  %v612_v29 = vld [vmem:[#allocation7 + $0x90] sm:$0xff]  ;;  %v614_v30 = vld [vmem:[#allocation7 + $0xa0] sm:$0xff]  ;;  %639 = vmatpush1.msra.mxu1 %v615_v26  ;;  %v2951_v52 = vsub.s32 2, %v2945_v50  ;;  %v2954_v53 = vsub.s32 3, %v2945_v50  ;;  %v2960_v55 = vsub.s32 0, %v2945_v50 }
  0x3e   : > { %v414_v1 = vsel %vm413_vm0, %v412_v0, 0.0  ;;  %485 = vmatprep.subr.mxu0 %v445_v14  ;;  %v617_v27 = vld [vmem:[#allocation7 + $0xb8] sm:$0xff]  ;;  %v610_v31 = vld [vmem:[#allocation7 + $0x80] sm:$0xff]  ;;  %v611_v32 = vld [vmem:[#allocation7 + $0x88] sm:$0xff]  ;;  %vm554_vm4 = vcmask 1046528   ;;  %vm568_vm5 = vcmask 1045504  }
  0x3f   : > { %415 = vadd.xlane.f32.xlu0 %v414_v1  ;;  %486 = vmatpush1.msra.mxu0 %v444_v15  ;;  %v613_v28 = vld [vmem:[#allocation7 + $0x98] sm:$0xff]  ;;  %v607_v34 = vld [vmem:[#allocation7 + $0x68] sm:$0xff]  ;;  %v608_v35 = vld [vmem:[#allocation7 + $0x70] sm:$0xff]  ;;  %vm582_vm6 = vcmask 1044480   ;;  %s407_s30 = scalar_lea.vmem [#allocation12], %s2893_s16  ;;  %s3544_s14 = smov 0  }
  0x40   : > { %2330 = vmatprep.subr.mxu0 %v2721_v11  ;;  %640 = vmatprep.subr.mxu1 %v613_v28  ;;  %v609_v33 = vld [vmem:[#allocation7 + $0x78] sm:$0xff]  ;;  %v606_v36 = vld [vmem:[#allocation7 + $0x60] sm:$0xff]  ;;  %v604_v37 = vld [vmem:[#allocation7 + $0x50] sm:$0xff] }
  0x41   : > { %641 = vmatpush1.msra.mxu1 %v612_v29  ;;  %v605_v38 = vld [vmem:[#allocation7 + $0x58] sm:$0xff]  ;;  %v603_v39 = vld [vmem:[#allocation7 + $0x48] sm:$0xff]  ;;  %v602_v41 = vld [vmem:[#allocation7 + $0x40] sm:$0xff] }
  0x42   : > { %642 = vmatprep.subr.mxu1 %v610_v31  ;;  %v601_v40 = vld [vmem:[#allocation7 + $0x38] sm:$0xff]  ;;  %v600_v42 = vld [vmem:[#allocation7 + $0x30] sm:$0xff]  ;;  %v598_v43 = vld [vmem:[#allocation7 + $0x20] sm:$0xff] }
  0x43   : > { %643 = vmatpush1.msra.mxu1 %v609_v33  ;;  %v599_v44 = vld [vmem:[#allocation7 + $0x28] sm:$0xff]  ;;  %v597_v45 = vld [vmem:[#allocation7 + $0x18] sm:$0xff]  ;;  %v596_v47 = vld [vmem:[#allocation7 + $0x10] sm:$0xff] }
  0x44   : > { %644 = vmatprep.subr.mxu1 %v607_v34  ;;  %v595_v46 = vld [vmem:[#allocation7 + $0x8] sm:$0xff]  ;;  %v594_v48 = vld [vmem:[#allocation7] sm:$0xff]  ;;  %v526_v54 = vld [vmem:[%s3697_s4] sm:$0xf]  ;;  %v1319_v34 = vsub.s32 5, %v2945_v50 }
  0x45   : > { %645 = vmatpush1.msra.mxu1 %v606_v36  ;;  %v549_v56 = vrot.slane %v526_v54, %v2948_v51  ;;  %v563_v57 = vrot.slane %v526_v54, %v2951_v52  ;;  %v577_v58 = vrot.slane %v526_v54, %v2954_v53  ;;  %v543_v60 = vrot.slane %v526_v54, %v2960_v55  ;;  %v2304_v28 = vld [vmem:[%s3700_s7] ss:$0 sm:$0xff] }
  0x46   : > { %646 = vmatprep.subr.mxu1 %v604_v37  ;;  %v1354_v37 = vsub.s32 6, %v2945_v50 }
  0x47   : > { %647 = vmatpush1.msra.mxu1 %v603_v39 }
  0x48   : > { %648 = vmatprep.subr.mxu1 %v601_v40 }
  0x49   : > { %649 = vmatpush1.msra.mxu1 %v600_v42 }
  0x4a   : > { %650 = vmatprep.subr.mxu1 %v598_v43 }
  0x4b   : > { %651 = vmatpush1.msra.mxu1 %v597_v45 }
  0x4c   : > { %652 = vmatprep.subr.mxu1 %v595_v46  ;;  %v2723_v46 = vmov 1966171168  }
  0x4d   : > { %653 = vmatpush1.msra.mxu1 %v594_v48 }
  0xc8   : > { %v416_v2 = vpop.xlane.xlu0 %415 }
  0xc9   : > { %v418_v3 = vmul.f32 0.03125, %v416_v2 }
  0xcb   : > { %v419_v4 = vsub.f32 %v412_v0, %v418_v3  ;;  %v2301_v0 = vld [vmem:[%s3698_s5] ss:$0 sm:$0xff] }
  0xcd   : > { %v420_v5 = vmul.f32 %v419_v4, %v419_v4 }
  0xcf   : > { %v421_v6 = vsel %vm413_vm0, %v420_v5, 0.0 }
  0xd0   : > { %422 = vadd.xlane.f32.xlu0 %v421_v6 }
 0x159   : > { %v423_v16 = vpop.xlane.xlu0 %422 }
 0x15a   : > { %v424_v17 = vmul.f32 0.03125, %v423_v16 }
 0x15c   : > { %v425_v18 = vadd.f32 1e-05, %v424_v17 }
 0x15e   : > { %2443 = vrsqrt.f32 %v425_v18 }
 0x16b   : > { %v2444_v19 = vpop.eup %2443 }
 0x16c   : > { %v427_v21 = vmul.f32 %v2444_v19, %v419_v4 }
 0x16e   : > { %v435_v23 = vmul.f32 %v2298_v20, %v427_v21 }
 0x170   : > { %v443_v24 = vadd.f32 %v2299_v22, %v435_v23 }
 0x172   : > { %2300 = vmatmul.mubr.msk.f32.vlgmr.msra.gmra.mxu0 %vm413_vm0, %v443_v24 }
 0x173   : > { %2331 = vmatpush3.msra.mxu0 %v617_v27  ;;  %2346 = vmatprep.mubr.msk.f32.mxu0 %vm2722_vm2, %v2721_v11 }
 0x174   : > { %2332 = vmatprep.subr.mxu0 %v2721_v11 }
 0x175   : > { %2333 = vmatpush3.msra.mxu0 %v614_v30 }
 0x176   : > { %2334 = vmatprep.subr.mxu0 %v2721_v11 }
 0x177   : > { %2335 = vmatpush3.msra.mxu0 %v611_v32 }
 0x178   : > { %2336 = vmatprep.subr.mxu0 %v2721_v11 }
 0x179   : > { %2337 = vmatpush3.msra.mxu0 %v608_v35 }
 0x17a   : > { %2338 = vmatprep.subr.mxu0 %v2721_v11 }
 0x17b   : > { %2339 = vmatpush3.msra.mxu0 %v605_v38  ;;  %v1389_v38 = vsub.s32 7, %v2945_v50 }
 0x17c   : > { %2340 = vmatprep.subr.mxu0 %v2721_v11 }
 0x17d   : > { %2341 = vmatpush3.msra.mxu0 %v602_v41 }
 0x17e   : > { %2342 = vmatprep.subr.mxu0 %v2721_v11 }
 0x17f   : > { %2343 = vmatpush3.msra.mxu0 %v599_v44 }
 0x180   : > { %2344 = vmatprep.subr.mxu0 %v2721_v11 }
 0x181   : > { %2345 = vmatpush3.msra.mxu0 %v596_v47  ;;  %v799_v47 = vunpack.c.l.s4 %v2723_v46 }
 0x232   : > { %v521_v59 = vpop.f32.mrf.mxu0 }
 0x233   : > { %v528_v61 = vrot.slane %v521_v59, 5 }
 0x234   : > { %v2966_v62 = vpop.f32.mrf.mxu0 }
 0x235   : > { %v531_v63 = vsel %vm530_vm3, 0.0, %v528_v61  ;;  %v551_v1 = vmul.f32 %v549_v56, %v528_v61  ;;  %v565_v2 = vmul.f32 %v563_v57, %v528_v61  ;;  %v579_v3 = vmul.f32 %v577_v58, %v528_v61 }
 0x236   : > { %v544_v4 = vmul.f32 %v543_v60, %v531_v63  ;;  %v550_v5 = vmul.f32 %v549_v56, %v531_v63  ;;  %v564_v6 = vmul.f32 %v563_v57, %v531_v63  ;;  %v578_v7 = vmul.f32 %v577_v58, %v531_v63 }
 0x237   : > { %v556_v8 = vrot.slane %v551_v1, 1  ;;  %v570_v13 = vrot.slane %v565_v2, 2  ;;  %v584_v16 = vrot.slane %v579_v3, 3  ;;  %v800_v56 = vunpack.c.0.s8 %v799_v47 }
 0x238   : > { %v545_v9 = vadd.f32 %v2301_v0, %v544_v4  ;;  %v555_v10 = vrot.slane %v550_v5, 1  ;;  %v569_v12 = vrot.slane %v564_v6, 2  ;;  %v583_v15 = vrot.slane %v578_v7, 3  ;;  %v3031_v6 = vld [vmem:[#allocation10] sm:$0xff]  ;;  %v3033_v7 = vld [vmem:[#allocation10 + $0x8] sm:$0xff] }
 0x239   : > { %v3013_v59 = vsub.s32 %v800_v56, %v2945_v50 }
 0x23a   : > { %v557_v14 = vsel %vm554_vm4, %v555_v10, %v556_v8  ;;  %v571_v18 = vsel %vm568_vm5, %v569_v12, %v570_v13  ;;  %v585_v20 = vsel %vm582_vm6, %v583_v15, %v584_v16  ;;  %v3035_v8 = vld [vmem:[#allocation10 + $0x10] sm:$0xff]  ;;  %v3040_v12 = vld [vmem:[#allocation10 + $0x20] sm:$0xff]  ;;  %v3042_v13 = vld [vmem:[#allocation10 + $0x28] sm:$0xff] }
 0x23b   : > { %v559_v17 = vadd.f32 %v557_v14, %v545_v9  ;;  %v3037_v9 = vld [vmem:[#allocation10 + $0x18] sm:$0xff]  ;;  %v3045_v15 = vld [vmem:[#allocation10 + $0x30] sm:$0xff] }
 0x23d   : > { %v573_v19 = vadd.f32 %v571_v18, %v559_v17 }
 0x23f   : > { %v587_v21 = vadd.f32 %v585_v20, %v573_v19  ;;  %v3050_v19 = vld [vmem:[#allocation10 + $0x38] sm:$0xff] }
 0x241   : > { %v588_v22 = vsub.f32 0.0, %v587_v21 }
 0x243   : > { %v589_v23 = vmul.f32 1.442695, %v588_v22 }
 0x245   : > { %2445 = vpow2.f32 %v589_v23 }
 0x252   : > { %v2446_v24 = vpop.eup %2445 }
 0x253   : > { %v591_v25 = vadd.f32 1.0, %v2446_v24 }
 0x255   : > { %2447 = vrcp.f32 %v591_v25 }
 0x262   : > { %v2448_v26 = vpop.eup %2447 }
 0x263   : > { %v2971_v27 = vmul.f32 %v2448_v26, %v587_v21 }
 0x265   : > { %2302 = vmatmul.mubr.msk.f32.vlgmr.msra.gmra.mxu1 %vm618_vm1, %v2971_v27  ;;  %2347 = vmatmul.mubr.msk.f32.vlgmr.msra.gmra.mxu0 %vm618_vm1, %v2971_v27 }
 0x325   : > { %v688_v29 = vpop.f32.mrf.mxu1  ;;  %v2980_v30 = vpop.f32.mrf.mxu0 }
 0x326   : > { %v770_v31 = vadd.f32 %v2304_v28, %v688_v29  ;;  %v1643_v32 = vrot.slane %v2980_v30, %v2960_v55  ;;  %v1678_v43 = vrot.slane %v2980_v30, %v2948_v51  ;;  %v1713_v48 = vrot.slane %v2980_v30, %v2951_v52 }
 0x327   : > { %v2984_v33 = vpop.f32.mrf.mxu1  ;;  %v2348_v35 = vpop.f32.mrf.mxu0  ;;  %v1748_v2 = vrot.slane %v2980_v30, %v2954_v53 }
 0x328   : > { %v772_v36 = vmin.f32 %v770_v31, 20.0  ;;  %1649 = vbcast.lane.b32.xlu0 %v1643_v32, 264  ;;  %1645 = vbcast.lane.b32.xlu1 %v1643_v32, 256  ;;  %v2992_v39 = vrot.slane %v2984_v33, %v1319_v34  ;;  %v2997_v41 = vrot.slane %v2984_v33, %v1354_v37  ;;  %v3002_v42 = vrot.slane %v2984_v33, %v1389_v38 }
 0x329   : > { %vm771_vm7 = vcmp.gt.f32.partialorder %v770_v31, 20.0 }
 0x32a   : > { %v773_v40 = vmul.f32 1.442695, %v772_v36 }
 0x32c   : > { %2449 = vpow2.f32 %v773_v40  ;;  %1657 = vbcast.lane.b32.xlu0 %v1643_v32, 280  ;;  %1653 = vbcast.lane.b32.xlu1 %v1643_v32, 272 }
 0x330   : > { %1665 = vbcast.lane.b32.xlu0 %v1643_v32, 296  ;;  %1661 = vbcast.lane.b32.xlu1 %v1643_v32, 288 }
 0x334   : > { %1673 = vbcast.lane.b32.xlu0 %v1643_v32, 312  ;;  %1669 = vbcast.lane.b32.xlu1 %v1643_v32, 304 }
 0x338   : > { %1684 = vbcast.lane.b32.xlu0 %v1678_v43, 264  ;;  %1680 = vbcast.lane.b32.xlu1 %v1678_v43, 256 }
 0x339   : > { %v2450_v44 = vpop.eup %2449 }
 0x33a   : > { %v775_v45 = vadd.f32 1.0, %v2450_v44 }
 0x33c   : > { %2451 = vlog2.f32 %v775_v45  ;;  %1692 = vbcast.lane.b32.xlu0 %v1678_v43, 280  ;;  %1688 = vbcast.lane.b32.xlu1 %v1678_v43, 272 }
 0x340   : > { %1700 = vbcast.lane.b32.xlu0 %v1678_v43, 296  ;;  %1696 = vbcast.lane.b32.xlu1 %v1678_v43, 288 }
 0x344   : > { %1708 = vbcast.lane.b32.xlu0 %v1678_v43, 312  ;;  %1704 = vbcast.lane.b32.xlu1 %v1678_v43, 304 }
 0x348   : > { %1719 = vbcast.lane.b32.xlu0 %v1713_v48, 264  ;;  %1715 = vbcast.lane.b32.xlu1 %v1713_v48, 256 }
 0x349   : > { %v2452_v49 = vpop.eup %2451 }
 0x34a   : > { %v777_v54 = vmul.f32 0.6931472, %v2452_v49 }
 0x34c   : > { %v3008_v57 = vsel %vm771_vm7, %v770_v31, %v777_v54  ;;  %1727 = vbcast.lane.b32.xlu0 %v1713_v48, 280  ;;  %1723 = vbcast.lane.b32.xlu1 %v1713_v48, 272 }
 0x34d   : > { %v787_v58 = vmul.f32 %v3008_v57, %v2971_v27  ;;  %v804_v1 = vrot.slane %v3008_v57, %v3013_v59  ;;  %v797_v54 = vcombine.high %v3008_v57, %v3008_v57 }
 0x34f   : > { %v1423_v60 = vcombine.high %v787_v58, %v787_v58  ;;  %v3016_v61 = vrot.slane %v787_v58, %v3013_v59  ;;  %v820_v3 = vrot.slane %v804_v1, %v3013_v59  ;;  %v812_v4 = vcombine.high %v804_v1, %v804_v1 }
 0x350   : > { %1735 = vbcast.lane.b32.xlu0 %v1713_v48, 296  ;;  %1731 = vbcast.lane.b32.xlu1 %v1713_v48, 288  ;;  %v3071_v57 = vrot.slane %v797_v54, %v3013_v59 }
 0x351   : > { %v3019_v63 = vrot.slane %v1423_v60, %v3013_v59  ;;  %v3023_v0 = vrot.slane %v3016_v61, %v3013_v59  ;;  %v849_v5 = vrot.slane %v820_v3, %v2960_v55  ;;  %v834_v10 = vrot.slane %v812_v4, %v3013_v59 }
 0x352   : > { %v842_v31 = vcombine.high %v820_v3, %v820_v3 }
 0x353   : > { %v886_v14 = vmul.f32 %v849_v5, %v3031_v6  ;;  %v887_v16 = vmul.f32 %v849_v5, %v3033_v7  ;;  %v888_v17 = vmul.f32 %v849_v5, %v3035_v8  ;;  %v889_v18 = vmul.f32 %v849_v5, %v3037_v9 }
 0x354   : > { %1743 = vbcast.lane.b32.xlu0 %v1713_v48, 312  ;;  %1739 = vbcast.lane.b32.xlu1 %v1713_v48, 304  ;;  %v853_v20 = vrot.slane %v834_v10, %v2960_v55  ;;  %v890_v21 = vmul.f32 %v849_v5, %v3040_v12  ;;  %v891_v22 = vmul.f32 %v849_v5, %v3042_v13 }
 0x355   : > { %v892_v23 = vmul.f32 %v849_v5, %v3045_v15  ;;  %v950_v24 = vmul.f32 1.442695, %v886_v14  ;;  %v893_v25 = vmul.f32 %v849_v5, %v3050_v19  ;;  %v952_v26 = vmul.f32 1.442695, %v887_v16 }
 0x356   : > { %v954_v28 = vmul.f32 1.442695, %v888_v17  ;;  %v956_v29 = vmul.f32 1.442695, %v889_v18  ;;  %v894_v32 = vmul.f32 %v853_v20, %v3031_v6  ;;  %v958_v35 = vmul.f32 1.442695, %v890_v21 }
 0x357   : > { %2453 = vpow2.f32 %v950_v24  ;;  %v895_v36 = vmul.f32 %v853_v20, %v3033_v7  ;;  %v960_v40 = vmul.f32 1.442695, %v891_v22  ;;  %v896_v43 = vmul.f32 %v853_v20, %v3035_v8 }
 0x358   : > { %1754 = vbcast.lane.b32.xlu0 %v1748_v2, 264  ;;  %1750 = vbcast.lane.b32.xlu1 %v1748_v2, 256  ;;  %2455 = vpow2.f32 %v952_v26  ;;  %v962_v44 = vmul.f32 1.442695, %v892_v23  ;;  %v897_v45 = vmul.f32 %v853_v20, %v3037_v9  ;;  %v964_v46 = vmul.f32 1.442695, %v893_v25 }
 0x359   : > { %2457 = vpow2.f32 %v954_v28  ;;  %v857_v47 = vrot.slane %v842_v31, %v2960_v55  ;;  %v898_v48 = vmul.f32 %v853_v20, %v3040_v12  ;;  %v966_v49 = vmul.f32 1.442695, %v894_v32 }
 0x35a   : > { %2459 = vpow2.f32 %v956_v29  ;;  %v899_v56 = vmul.f32 %v853_v20, %v3042_v13  ;;  %v968_v58 = vmul.f32 1.442695, %v895_v36  ;;  %v900_v60 = vmul.f32 %v853_v20, %v3045_v15 }
 0x35b   : > { %2461 = vpow2.f32 %v958_v35  ;;  %v970_v1 = vmul.f32 1.442695, %v896_v43  ;;  %v901_v3 = vmul.f32 %v853_v20, %v3050_v19  ;;  %v972_v4 = vmul.f32 1.442695, %v897_v45 }
 0x35c   : > { %1762 = vbcast.lane.b32.xlu0 %v1748_v2, 280  ;;  %1758 = vbcast.lane.b32.xlu1 %v1748_v2, 272  ;;  %2463 = vpow2.f32 %v960_v40  ;;  %v902_v5 = vmul.f32 %v857_v47, %v3031_v6  ;;  %v974_v14 = vmul.f32 1.442695, %v898_v48  ;;  %v1284_v16 = vsub.s32 4, %v2945_v50 }
 0x35d   : > { %2465 = vpow2.f32 %v962_v44  ;;  %v903_v17 = vmul.f32 %v857_v47, %v3033_v7  ;;  %v976_v18 = vmul.f32 1.442695, %v899_v56  ;;  %v904_v21 = vmul.f32 %v857_v47, %v3035_v8 }
 0x35e   : > { %2467 = vpow2.f32 %v964_v46  ;;  %v905_v22 = vmul.f32 %v857_v47, %v3037_v9  ;;  %v980_v23 = vmul.f32 1.442695, %v901_v3  ;;  %v906_v24 = vmul.f32 %v857_v47, %v3040_v12 }
 0x35f   : > { %2469 = vpow2.f32 %v966_v49  ;;  %v982_v25 = vmul.f32 1.442695, %v902_v5  ;;  %v3083_v26 = vrot.slane %v2980_v30, %v1284_v16  ;;  %v3087_v29 = vrot.slane %v3071_v57, %v3013_v59 }
 0x360   : > { %1770 = vbcast.lane.b32.xlu0 %v1748_v2, 296  ;;  %1766 = vbcast.lane.b32.xlu1 %v1748_v2, 288  ;;  %2471 = vpow2.f32 %v968_v58  ;;  %v907_v31 = vmul.f32 %v857_v47, %v3042_v13  ;;  %v984_v32 = vmul.f32 1.442695, %v903_v17  ;;  %v813_v36 = vcombine.high %v3071_v57, %v3071_v57 }
 0x361   : > { %2473 = vpow2.f32 %v970_v1  ;;  %v908_v40 = vmul.f32 %v857_v47, %v3045_v15  ;;  %v986_v43 = vmul.f32 1.442695, %v904_v21  ;;  %v909_v45 = vmul.f32 %v857_v47, %v3050_v19 }
 0x362   : > { %2475 = vpow2.f32 %v972_v4  ;;  %v988_v48 = vmul.f32 1.442695, %v905_v22  ;;  %v990_v54 = vmul.f32 1.442695, %v906_v24  ;;  %v1438_v56 = vcombine.high %v3016_v61, %v3016_v61 }
 0x363   : > { %2477 = vpow2.f32 %v974_v14  ;;  %v1439_v58 = vcombine.high %v3019_v63, %v3019_v63  ;;  %v3105_v47 = vrot.slane %v3087_v29, %v2960_v55  ;;  %v994_v5 = vmul.f32 1.442695, %v908_v40 }
 0x364   : > { %1778 = vbcast.lane.b32.xlu0 %v1748_v2, 312  ;;  %1774 = vbcast.lane.b32.xlu1 %v1748_v2, 304  ;;  %v844_v2 = vcombine.high %v834_v10, %v834_v10  ;;  %v978_v10 = vmul.f32 1.442695, %v900_v60  ;;  %v2454_v28 = vpop.eup %2453  ;;  %2479 = vpow2.f32 %v976_v18  ;;  %v996_v17 = vmul.f32 1.442695, %v909_v45 }
 0x365   : > { %v2456_v35 = vpop.eup %2455  ;;  %1078 = vst.msk [vmem:[#allocation2] sm:$0xff] %vm618_vm1, %v2454_v28  ;;  %v3124_v22 = vrot.slane %v1438_v56, %v3013_v59  ;;  %v3141_v45 = vrot.slane %v813_v36, %v3013_v59  ;;  %v920_v36 = vmul.f32 %v3105_v47, %v3035_v8 }
 0x366   : > { %v3076_v20 = vrot.slane %v844_v2, %v2960_v55  ;;  %2481 = vpow2.f32 %v978_v10  ;;  %v2458_v44 = vpop.eup %2457  ;;  %1079 = vst.msk [vmem:[#allocation2 + $0x8] sm:$0xff] %vm618_vm1, %v2456_v35  ;;  %v992_v2 = vmul.f32 1.442695, %v907_v31  ;;  %v3121_v10 = vrot.slane %v3019_v63, %v3013_v59 }
 0x367   : > { %2483 = vpow2.f32 %v980_v23  ;;  %v2460_v49 = vpop.eup %2459  ;;  %1080 = vst.msk [vmem:[#allocation2 + $0x10] sm:$0xff] %vm618_vm1, %v2458_v44  ;;  %v3127_v23 = vrot.slane %v1439_v58, %v3013_v59 }
 0x368   : > { %v910_v46 = vmul.f32 %v3076_v20, %v3031_v6  ;;  %2485 = vpow2.f32 %v982_v25  ;;  %v2462_v60 = vpop.eup %2461  ;;  %v911_v1 = vmul.f32 %v3076_v20, %v3033_v7  ;;  %1081 = vst.msk [vmem:[#allocation2 + $0x18] sm:$0xff] %vm618_vm1, %v2460_v49  ;;  %v912_v4 = vmul.f32 %v3076_v20, %v3035_v8  ;;  %1789 = vbcast.lane.b32.xlu0 %v3083_v26, 264 }
 0x369   : > { %2487 = vpow2.f32 %v984_v32  ;;  %v2464_v3 = vpop.eup %2463  ;;  %v913_v61 = vmul.f32 %v3076_v20, %v3037_v9  ;;  %1082 = vst.msk [vmem:[#allocation2 + $0x20] sm:$0xff] %vm618_vm1, %v2462_v60  ;;  %v914_v57 = vmul.f32 %v3076_v20, %v3040_v12  ;;  %1785 = vbcast.lane.b32.xlu1 %v3083_v26, 256  ;;  %v915_v25 = vmul.f32 %v3076_v20, %v3042_v13 }
 0x36a   : > { %2489 = vpow2.f32 %v986_v43  ;;  %v2466_v14 = vpop.eup %2465  ;;  %v998_v18 = vmul.f32 1.442695, %v910_v46  ;;  %1083 = vst.msk [vmem:[#allocation2 + $0x28] sm:$0xff] %vm618_vm1, %v2464_v3  ;;  %v1000_v28 = vmul.f32 1.442695, %v911_v1  ;;  %v916_v31 = vmul.f32 %v3076_v20, %v3045_v15 }
 0x36b   : > { %2491 = vpow2.f32 %v988_v48  ;;  %v2468_v21 = vpop.eup %2467  ;;  %1084 = vst.msk [vmem:[#allocation2 + $0x30] sm:$0xff] %vm618_vm1, %v2466_v14  ;;  %v1002_v32 = vmul.f32 1.442695, %v912_v4  ;;  %v917_v40 = vmul.f32 %v3076_v20, %v3050_v19  ;;  %v1004_v43 = vmul.f32 1.442695, %v913_v61 }
 0x36c   : > { %2493 = vpow2.f32 %v990_v54  ;;  %v2470_v24 = vpop.eup %2469  ;;  %1085 = vst.msk [vmem:[#allocation2 + $0x38] sm:$0xff] %vm618_vm1, %v2468_v21  ;;  %v918_v46 = vmul.f32 %v3105_v47, %v3031_v6  ;;  %v1006_v48 = vmul.f32 1.442695, %v914_v57  ;;  %1797 = vbcast.lane.b32.xlu0 %v3083_v26, 280  ;;  %v919_v49 = vmul.f32 %v3105_v47, %v3033_v7 }
 0x36d   : > { %2495 = vpow2.f32 %v992_v2  ;;  %v2472_v63 = vpop.eup %2471  ;;  %1086 = vst.msk [vmem:[#allocation2 + $0x40] sm:$0xff] %vm618_vm1, %v2470_v24  ;;  %1793 = vbcast.lane.b32.xlu1 %v3083_v26, 272  ;;  %v1008_v54 = vmul.f32 1.442695, %v915_v25  ;;  %v1010_v56 = vmul.f32 1.442695, %v916_v31  ;;  %v921_v60 = vmul.f32 %v3105_v47, %v3037_v9 }
 0x36e   : > { %2497 = vpow2.f32 %v994_v5  ;;  %v2474_v35 = vpop.eup %2473  ;;  %1087 = vst.msk [vmem:[#allocation2 + $0x48] sm:$0xff] %vm618_vm1, %v2472_v63  ;;  %v1012_v1 = vmul.f32 1.442695, %v917_v40  ;;  %v3159_v3 = vrot.slane %v3141_v45, %v2960_v55  ;;  %v922_v4 = vmul.f32 %v3105_v47, %v3040_v12 }
 0x36f   : > { %2499 = vpow2.f32 %v996_v17  ;;  %v2476_v44 = vpop.eup %2475  ;;  %1088 = vst.msk [vmem:[#allocation2 + $0x50] sm:$0xff] %vm618_vm1, %v2474_v35  ;;  %v1014_v61 = vmul.f32 1.442695, %v918_v46  ;;  %v923_v14 = vmul.f32 %v3105_v47, %v3042_v13  ;;  %v1016_v57 = vmul.f32 1.442695, %v919_v49 }
 0x370   : > { %2501 = vpow2.f32 %v998_v18  ;;  %v2478_v20 = vpop.eup %2477  ;;  %1089 = vst.msk [vmem:[#allocation2 + $0x58] sm:$0xff] %vm618_vm1, %v2476_v44  ;;  %1805 = vbcast.lane.b32.xlu0 %v3083_v26, 296  ;;  %v924_v18 = vmul.f32 %v3105_v47, %v3045_v15  ;;  %v1018_v21 = vmul.f32 1.442695, %v920_v36  ;;  %v925_v25 = vmul.f32 %v3105_v47, %v3050_v19 }
 0x371   : > { %2503 = vpow2.f32 %v1000_v28  ;;  %v2480_v59 = vpop.eup %2479  ;;  %1090 = vst.msk [vmem:[#allocation2 + $0x60] sm:$0xff] %vm618_vm1, %v2478_v20  ;;  %1801 = vbcast.lane.b32.xlu1 %v3083_v26, 288  ;;  %v1020_v28 = vmul.f32 1.442695, %v921_v60  ;;  %v843_v31 = vcombine.high %v3087_v29, %v3087_v29  ;;  %v1022_v35 = vmul.f32 1.442695, %v922_v4 }
 0x372   : > { %2505 = vpow2.f32 %v1002_v32  ;;  %1091 = vst.msk [vmem:[#allocation2 + $0x68] sm:$0xff] %vm618_vm1, %v2480_v59  ;;  %v926_v32 = vmul.f32 %v3159_v3, %v3031_v6  ;;  %v927_v40 = vmul.f32 %v3159_v3, %v3033_v7  ;;  %v928_v44 = vmul.f32 %v3159_v3, %v3035_v8 }
 0x373   : > { %v2482_v58 = vpop.eup %2481  ;;  %2507 = vpow2.f32 %v1004_v43  ;;  %v1024_v43 = vmul.f32 1.442695, %v923_v14  ;;  %v1026_v46 = vmul.f32 1.442695, %v924_v18  ;;  %v929_v20 = vmul.f32 %v3159_v3, %v3037_v9 }
 0x374   : > { %v2484_v2 = vpop.eup %2483  ;;  %2509 = vpow2.f32 %v1006_v48  ;;  %1092 = vst.msk [vmem:[#allocation2 + $0x70] sm:$0xff] %vm618_vm1, %v2482_v58  ;;  %1813 = vbcast.lane.b32.xlu0 %v3083_v26, 312  ;;  %v1028_v49 = vmul.f32 1.442695, %v925_v25  ;;  %v3197_v59 = vrot.slane %v843_v31, %v2960_v55  ;;  %v930_v36 = vmul.f32 %v3159_v3, %v3040_v12 }
 0x375   : > { %v2486_v5 = vpop.eup %2485  ;;  %2511 = vpow2.f32 %v1008_v54  ;;  %1093 = vst.msk [vmem:[#allocation2 + $0x78] sm:$0xff] %vm618_vm1, %v2484_v2  ;;  %1809 = vbcast.lane.b32.xlu1 %v3083_v26, 304  ;;  %v3191_v26 = vrot.slane %v2980_v30, %v1319_v34  ;;  %v931_v58 = vmul.f32 %v3159_v3, %v3042_v13  ;;  %v1032_v60 = vmul.f32 1.442695, %v927_v40 }
 0x376   : > { %v2488_v17 = vpop.eup %2487  ;;  %2513 = vpow2.f32 %v1010_v56  ;;  %1094 = vst.msk [vmem:[#allocation2 + $0x80] sm:$0xff] %vm618_vm1, %v2486_v5  ;;  %v1030_v56 = vmul.f32 1.442695, %v926_v32  ;;  %v932_v2 = vmul.f32 %v3159_v3, %v3045_v15  ;;  %v1034_v4 = vmul.f32 1.442695, %v928_v44 }
 0x377   : > { %v2490_v24 = vpop.eup %2489  ;;  %2515 = vpow2.f32 %v1012_v1  ;;  %1095 = vst.msk [vmem:[#allocation2 + $0x88] sm:$0xff] %vm618_vm1, %v2488_v17  ;;  %v933_v5 = vmul.f32 %v3159_v3, %v3050_v19  ;;  %v1036_v14 = vmul.f32 1.442695, %v929_v20  ;;  %v845_v17 = vcombine.high %v3141_v45, %v3141_v45 }
 0x378   : > { %v2492_v63 = vpop.eup %2491  ;;  %2517 = vpow2.f32 %v1014_v61  ;;  %1096 = vst.msk [vmem:[#allocation2 + $0x90] sm:$0xff] %vm618_vm1, %v2490_v24  ;;  %1824 = vbcast.lane.b32.xlu0 %v3191_v26, 264  ;;  %v934_v18 = vmul.f32 %v3197_v59, %v3031_v6  ;;  %v935_v24 = vmul.f32 %v3197_v59, %v3033_v7  ;;  %v1040_v25 = vmul.f32 1.442695, %v931_v58 }
 0x379   : > { %v2494_v47 = vpop.eup %2493  ;;  %2519 = vpow2.f32 %v1016_v57  ;;  %1097 = vst.msk [vmem:[#allocation2 + $0x98] sm:$0xff] %vm618_vm1, %v2492_v63  ;;  %1820 = vbcast.lane.b32.xlu1 %v3191_v26, 256  ;;  %v1042_v63 = vmul.f32 1.442695, %v932_v2  ;;  %v937_v32 = vmul.f32 %v3197_v59, %v3037_v9  ;;  %v3230_v40 = vrot.slane %v845_v17, %v2960_v55 }
 0x37a   : > { %v2496_v29 = vpop.eup %2495  ;;  %2521 = vpow2.f32 %v1018_v21  ;;  %1098 = vst.msk [vmem:[#allocation2 + $0xa0] sm:$0xff] %vm618_vm1, %v2494_v47  ;;  %v1038_v21 = vmul.f32 1.442695, %v930_v36 }
 0x37b   : > { %v2498_v48 = vpop.eup %2497  ;;  %2523 = vpow2.f32 %v1020_v28  ;;  %1099 = vst.msk [vmem:[#allocation2 + $0xa8] sm:$0xff] %vm618_vm1, %v2496_v29  ;;  %v936_v28 = vmul.f32 %v3197_v59, %v3035_v8  ;;  %v1046_v29 = vmul.f32 1.442695, %v934_v18 }
 0x37c   : > { %v2500_v54 = vpop.eup %2499  ;;  %2525 = vpow2.f32 %v1022_v35  ;;  %1100 = vst.msk [vmem:[#allocation2 + $0xb0] sm:$0xff] %vm618_vm1, %v2498_v48  ;;  %1832 = vbcast.lane.b32.xlu0 %v3191_v26, 280  ;;  %v1044_v35 = vmul.f32 1.442695, %v933_v5  ;;  %v1048_v48 = vmul.f32 1.442695, %v935_v24 }
 0x37d   : > { %v2502_v34 = vpop.eup %2501  ;;  %2527 = vpow2.f32 %v1024_v43  ;;  %1101 = vst.msk [vmem:[#allocation2 + $0xb8] sm:$0xff] %vm618_vm1, %v2500_v54  ;;  %1828 = vbcast.lane.b32.xlu1 %v3191_v26, 272  ;;  %v938_v43 = vmul.f32 %v3197_v59, %v3040_v12  ;;  %v1050_v54 = vmul.f32 1.442695, %v936_v28 }
 0x37e   : > { %v2504_v1 = vpop.eup %2503  ;;  %2529 = vpow2.f32 %v1026_v46  ;;  %1102 = vst.msk [vmem:[#allocation2 + $0xc0] sm:$0xff] %vm618_vm1, %v2502_v34  ;;  %v939_v46 = vmul.f32 %v3197_v59, %v3042_v13  ;;  %v1052_v34 = vmul.f32 1.442695, %v937_v32 }
 0x37f   : > { %v2506_v61 = vpop.eup %2505  ;;  %2531 = vpow2.f32 %v1028_v49  ;;  %1103 = vst.msk [vmem:[#allocation2 + $0xc8] sm:$0xff] %vm618_vm1, %v2504_v1  ;;  %v940_v49 = vmul.f32 %v3197_v59, %v3045_v15  ;;  %v1054_v1 = vmul.f32 1.442695, %v938_v43 }
 0x380   : > { %v2508_v57 = vpop.eup %2507  ;;  %2533 = vpow2.f32 %v1030_v56  ;;  %1104 = vst.msk [vmem:[#allocation2 + $0xd0] sm:$0xff] %vm618_vm1, %v2506_v61  ;;  %1840 = vbcast.lane.b32.xlu0 %v3191_v26, 296  ;;  %v941_v56 = vmul.f32 %v3197_v59, %v3050_v19  ;;  %v943_v59 = vmul.f32 %v3230_v40, %v3033_v7  ;;  %v945_v7 = vmul.f32 %v3230_v40, %v3037_v9 }
 0x381   : > { %v2510_v3 = vpop.eup %2509  ;;  %2535 = vpow2.f32 %v1032_v60  ;;  %1105 = vst.msk [vmem:[#allocation2 + $0xd8] sm:$0xff] %vm618_vm1, %v2508_v57  ;;  %1836 = vbcast.lane.b32.xlu1 %v3191_v26, 288  ;;  %v942_v60 = vmul.f32 %v3230_v40, %v3031_v6  ;;  %v944_v6 = vmul.f32 %v3230_v40, %v3035_v8  ;;  %v1058_v5 = vmul.f32 1.442695, %v940_v49 }
 0x382   : > { %v2512_v45 = vpop.eup %2511  ;;  %2537 = vpow2.f32 %v1034_v4  ;;  %1106 = vst.msk [vmem:[#allocation2 + $0xe0] sm:$0xff] %vm618_vm1, %v2510_v3  ;;  %v1056_v4 = vmul.f32 1.442695, %v939_v46  ;;  %v1060_v57 = vmul.f32 1.442695, %v941_v56  ;;  %v947_v9 = vmul.f32 %v3230_v40, %v3042_v13 }
 0x383   : > { %v2514_v31 = vpop.eup %2513  ;;  %2539 = vpow2.f32 %v1036_v14  ;;  %1107 = vst.msk [vmem:[#allocation2 + $0xe8] sm:$0xff] %vm618_vm1, %v2512_v45  ;;  %v1062_v3 = vmul.f32 1.442695, %v942_v60  ;;  %v1064_v24 = vmul.f32 1.442695, %v943_v59 }
 0x384   : > { %v2516_v47 = vpop.eup %2515  ;;  %2541 = vpow2.f32 %v1038_v21  ;;  %1108 = vst.msk [vmem:[#allocation2 + $0xf0] sm:$0xff] %vm618_vm1, %v2514_v31  ;;  %1848 = vbcast.lane.b32.xlu0 %v3191_v26, 312  ;;  %v946_v21 = vmul.f32 %v3230_v40, %v3040_v12  ;;  %v1066_v45 = vmul.f32 1.442695, %v944_v6  ;;  %v1068_v31 = vmul.f32 1.442695, %v945_v7 }
 0x385   : > { %v2518_v44 = vpop.eup %2517  ;;  %2543 = vpow2.f32 %v1040_v25  ;;  %1109 = vst.msk [vmem:[#allocation2 + $0xf8] sm:$0xff] %vm618_vm1, %v2516_v47  ;;  %1844 = vbcast.lane.b32.xlu1 %v3191_v26, 304  ;;  %v3260_v26 = vrot.slane %v2980_v30, %v1354_v37  ;;  %v948_v25 = vmul.f32 %v3230_v40, %v3045_v15 }
 0x386   : > { %v2520_v20 = vpop.eup %2519  ;;  %2545 = vpow2.f32 %v1042_v63  ;;  %1110 = vst.msk [vmem:[#allocation2 + $0x100] sm:$0xff] %vm618_vm1, %v2518_v44  ;;  %v949_v63 = vmul.f32 %v3230_v40, %v3050_v19  ;;  %v1070_v47 = vmul.f32 1.442695, %v946_v21  ;;  %v1072_v19 = vmul.f32 1.442695, %v947_v9 }
 0x387   : > { %v2522_v36 = vpop.eup %2521  ;;  %2547 = vpow2.f32 %v1044_v35  ;;  %1111 = vst.msk [vmem:[#allocation2 + $0x108] sm:$0xff] %vm618_vm1, %v2520_v20  ;;  %v1074_v43 = vmul.f32 1.442695, %v948_v25 }
 0x388   : > { %v2524_v58 = vpop.eup %2523  ;;  %2549 = vpow2.f32 %v1046_v29  ;;  %1112 = vst.msk [vmem:[#allocation2 + $0x110] sm:$0xff] %vm618_vm1, %v2522_v36  ;;  %1859 = vbcast.lane.b32.xlu0 %v3260_v26, 264  ;;  %v1076_v44 = vmul.f32 1.442695, %v949_v63 }
 0x389   : > { %v2526_v2 = vpop.eup %2525  ;;  %2551 = vpow2.f32 %v1048_v48  ;;  %1113 = vst.msk [vmem:[#allocation2 + $0x118] sm:$0xff] %vm618_vm1, %v2524_v58  ;;  %1855 = vbcast.lane.b32.xlu1 %v3260_v26, 256 }
 0x38a   : > { %v2528_v61 = vpop.eup %2527  ;;  %2553 = vpow2.f32 %v1050_v54  ;;  %1114 = vst.msk [vmem:[#allocation2 + $0x120] sm:$0xff] %vm618_vm1, %v2526_v2  ;;  %v3307_v2 = vrot.slane %v2980_v30, %v1389_v38 }
 0x38b   : > { %v2530_v14 = vpop.eup %2529  ;;  %2555 = vpow2.f32 %v1052_v34  ;;  %1115 = vst.msk [vmem:[#allocation2 + $0x128] sm:$0xff] %vm618_vm1, %v2528_v61 }
 0x38c   : > { %v2532_v8 = vpop.eup %2531  ;;  %2557 = vpow2.f32 %v1054_v1  ;;  %1116 = vst.msk [vmem:[#allocation2 + $0x130] sm:$0xff] %vm618_vm1, %v2530_v14  ;;  %1867 = vbcast.lane.b32.xlu0 %v3260_v26, 280 }
 0x38d   : > { %v2534_v37 = vpop.eup %2533  ;;  %2559 = vpow2.f32 %v1056_v4  ;;  %1117 = vst.msk [vmem:[#allocation2 + $0x138] sm:$0xff] %vm618_vm1, %v2532_v8  ;;  %1863 = vbcast.lane.b32.xlu1 %v3260_v26, 272 }
 0x38e   : > { %v2536_v12 = vpop.eup %2535  ;;  %2561 = vpow2.f32 %v1058_v5  ;;  %1118 = vst.msk [vmem:[#allocation2 + $0x140] sm:$0xff] %vm618_vm1, %v2534_v37  ;;  %v1145_v37 = vrot.slane %v2984_v33, %v2960_v55 }
 0x38f   : > { %v2538_v28 = vpop.eup %2537  ;;  %2563 = vpow2.f32 %v1060_v57  ;;  %1119 = vst.msk [vmem:[#allocation2 + $0x148] sm:$0xff] %vm618_vm1, %v2536_v12  ;;  %v1180_v12 = vrot.slane %v2984_v33, %v2948_v51 }
 0x390   : > { %v2540_v35 = vpop.eup %2539  ;;  %2565 = vpow2.f32 %v1062_v3  ;;  %1120 = vst.msk [vmem:[#allocation2 + $0x150] sm:$0xff] %vm618_vm1, %v2538_v28  ;;  %1875 = vbcast.lane.b32.xlu0 %v3260_v26, 296 }
 0x391   : > { %v2542_v15 = vpop.eup %2541  ;;  %2567 = vpow2.f32 %v1064_v24  ;;  %1121 = vst.msk [vmem:[#allocation2 + $0x158] sm:$0xff] %vm618_vm1, %v2540_v35  ;;  %1871 = vbcast.lane.b32.xlu1 %v3260_v26, 288  ;;  %v1215_v35 = vrot.slane %v2984_v33, %v2951_v52 }
 0x392   : > { %v2544_v40 = vpop.eup %2543  ;;  %2569 = vpow2.f32 %v1066_v45  ;;  %1122 = vst.msk [vmem:[#allocation2 + $0x160] sm:$0xff] %vm618_vm1, %v2542_v15 }
 0x393   : > { %v2546_v29 = vpop.eup %2545  ;;  %2571 = vpow2.f32 %v1068_v31  ;;  %1123 = vst.msk [vmem:[#allocation2 + $0x168] sm:$0xff] %vm618_vm1, %v2544_v40 }
 0x394   : > { %v2548_v20 = vpop.eup %2547  ;;  %2573 = vpow2.f32 %v1070_v47  ;;  %1124 = vst.msk [vmem:[#allocation2 + $0x170] sm:$0xff] %vm618_vm1, %v2546_v29  ;;  %1883 = vbcast.lane.b32.xlu0 %v3260_v26, 312 }
 0x395   : > { %v2550_v49 = vpop.eup %2549  ;;  %2575 = vpow2.f32 %v1072_v19  ;;  %1125 = vst.msk [vmem:[#allocation2 + $0x178] sm:$0xff] %vm618_vm1, %v2548_v20  ;;  %1879 = vbcast.lane.b32.xlu1 %v3260_v26, 304 }
 0x396   : > { %v2552_v54 = vpop.eup %2551  ;;  %2577 = vpow2.f32 %v1074_v43  ;;  %1126 = vst.msk [vmem:[#allocation2 + $0x180] sm:$0xff] %vm618_vm1, %v2550_v49 }
 0x397   : > { %v2554_v36 = vpop.eup %2553  ;;  %2579 = vpow2.f32 %v1076_v44  ;;  %1127 = vst.msk [vmem:[#allocation2 + $0x188] sm:$0xff] %vm618_vm1, %v2552_v54 }
 0x398   : > { %v2556_v58 = vpop.eup %2555  ;;  %1128 = vst.msk [vmem:[#allocation2 + $0x190] sm:$0xff] %vm618_vm1, %v2554_v36  ;;  %1894 = vbcast.lane.b32.xlu0 %v3307_v2, 264 }
 0x399   : > { %v2558_v60 = vpop.eup %2557  ;;  %1129 = vst.msk [vmem:[#allocation2 + $0x198] sm:$0xff] %vm618_vm1, %v2556_v58  ;;  %1890 = vbcast.lane.b32.xlu1 %v3307_v2, 256 }
 0x39a   : > { %v1650_v17 = vpop.permute.xlu0 %1649  ;;  %v1646_v18 = vpop.permute.xlu1 %1645  ;;  %1130 = vst.msk [vmem:[#allocation2 + $0x1a0] sm:$0xff] %vm618_vm1, %v2558_v60 }
 0x39b   : > { %1921 = vst.msk [vmem:[#allocation4 + $0x8] sm:$0xff] %vm618_vm1, %v1650_v17  ;;  %1920 = vst.msk [vmem:[#allocation4] sm:$0xff] %vm618_vm1, %v1646_v18  ;;  %v2560_v1 = vpop.eup %2559 }
 0x39c   : > { %v2562_v59 = vpop.eup %2561  ;;  %1131 = vst.msk [vmem:[#allocation2 + $0x1a8] sm:$0xff] %vm618_vm1, %v2560_v1  ;;  %1902 = vbcast.lane.b32.xlu0 %v3307_v2, 280 }
 0x39d   : > { %v2564_v6 = vpop.eup %2563  ;;  %1132 = vst.msk [vmem:[#allocation2 + $0x1b0] sm:$0xff] %vm618_vm1, %v2562_v59  ;;  %1898 = vbcast.lane.b32.xlu1 %v3307_v2, 272 }
 0x39e   : > { %v1658_v13 = vpop.permute.xlu0 %1657  ;;  %v1654_v32 = vpop.permute.xlu1 %1653  ;;  %1133 = vst.msk [vmem:[#allocation2 + $0x1b8] sm:$0xff] %vm618_vm1, %v2564_v6 }
 0x39f   : > { %1923 = vst.msk [vmem:[#allocation4 + $0x18] sm:$0xff] %vm618_vm1, %v1658_v13  ;;  %1922 = vst.msk [vmem:[#allocation4 + $0x10] sm:$0xff] %vm618_vm1, %v1654_v32  ;;  %v2566_v5 = vpop.eup %2565 }
 0x3a0   : > { %v2568_v30 = vpop.eup %2567  ;;  %1134 = vst.msk [vmem:[#allocation2 + $0x1c0] sm:$0xff] %vm618_vm1, %v2566_v5  ;;  %1910 = vbcast.lane.b32.xlu0 %v3307_v2, 296 }
 0x3a1   : > { %v2570_v38 = vpop.eup %2569  ;;  %1135 = vst.msk [vmem:[#allocation2 + $0x1c8] sm:$0xff] %vm618_vm1, %v2568_v30  ;;  %1906 = vbcast.lane.b32.xlu1 %v3307_v2, 288 }
 0x3a2   : > { %v1666_v46 = vpop.permute.xlu0 %1665  ;;  %v1662_v48 = vpop.permute.xlu1 %1661  ;;  %1136 = vst.msk [vmem:[#allocation2 + $0x1d0] sm:$0xff] %vm618_vm1, %v2570_v38 }
 0x3a3   : > { %1925 = vst.msk [vmem:[#allocation4 + $0x28] sm:$0xff] %vm618_vm1, %v1666_v46  ;;  %1924 = vst.msk [vmem:[#allocation4 + $0x20] sm:$0xff] %vm618_vm1, %v1662_v48  ;;  %v2572_v7 = vpop.eup %2571  ;;  %v1250_v46 = vrot.slane %v2984_v33, %v2954_v53  ;;  %v1285_v48 = vrot.slane %v2984_v33, %v1284_v16 }
 0x3a4   : > { %v2574_v57 = vpop.eup %2573  ;;  %1137 = vst.msk [vmem:[#allocation2 + $0x1d8] sm:$0xff] %vm618_vm1, %v2572_v7  ;;  %1155 = vbcast.lane.b32.xlu0 %v1145_v37, 272 }
 0x3a5   : > { %v2576_v17 = vpop.eup %2575  ;;  %1138 = vst.msk [vmem:[#allocation2 + $0x1e0] sm:$0xff] %vm618_vm1, %v2574_v57  ;;  %1147 = vbcast.lane.b32.xlu1 %v1145_v37, 256 }
 0x3a6   : > { %v1674_v56 = vpop.permute.xlu0 %1673  ;;  %v1670_v34 = vpop.permute.xlu1 %1669  ;;  %1139 = vst.msk [vmem:[#allocation2 + $0x1e8] sm:$0xff] %vm618_vm1, %v2576_v17 }
 0x3a7   : > { %1927 = vst.msk [vmem:[#allocation4 + $0x38] sm:$0xff] %vm618_vm1, %v1674_v56  ;;  %1926 = vst.msk [vmem:[#allocation4 + $0x30] sm:$0xff] %vm618_vm1, %v1670_v34  ;;  %v2578_v18 = vpop.eup %2577 }
 0x3a8   : > { %v2580_v3 = vpop.eup %2579  ;;  %1140 = vst.msk [vmem:[#allocation2 + $0x1f0] sm:$0xff] %vm618_vm1, %v2578_v18  ;;  %1186 = vbcast.lane.b32.xlu0 %v1180_v12, 264 }
 0x3a9   : > { %1141 = vst.msk [vmem:[#allocation2 + $0x1f8] sm:$0xff] %vm618_vm1, %v2580_v3  ;;  %1151 = vbcast.lane.b32.xlu1 %v1145_v37, 264 }
 0x3aa   : > { %v1685_v4 = vpop.permute.xlu0 %1684  ;;  %v1681_v61 = vpop.permute.xlu1 %1680 }
 0x3ab   : > { %1929 = vst.msk [vmem:[#allocation4 + $0x48] sm:$0xff] %vm618_vm1, %v1685_v4  ;;  %1928 = vst.msk [vmem:[#allocation4 + $0x40] sm:$0xff] %vm618_vm1, %v1681_v61 }
 0x3ac   : > { %1194 = vbcast.lane.b32.xlu0 %v1180_v12, 280 }
 0x3ad   : > { %1159 = vbcast.lane.b32.xlu1 %v1145_v37, 280 }
 0x3ae   : > { %v1693_v26 = vpop.permute.xlu0 %1692  ;;  %v1689_v14 = vpop.permute.xlu1 %1688 }
 0x3af   : > { %1931 = vst.msk [vmem:[#allocation4 + $0x58] sm:$0xff] %vm618_vm1, %v1693_v26  ;;  %1930 = vst.msk [vmem:[#allocation4 + $0x50] sm:$0xff] %vm618_vm1, %v1689_v14 }
 0x3b0   : > { %1202 = vbcast.lane.b32.xlu0 %v1180_v12, 296 }
 0x3b1   : > { %1163 = vbcast.lane.b32.xlu1 %v1145_v37, 288 }
 0x3b2   : > { %v1701_v8 = vpop.permute.xlu0 %1700  ;;  %v1697_v21 = vpop.permute.xlu1 %1696 }
 0x3b3   : > { %1933 = vst.msk [vmem:[#allocation4 + $0x68] sm:$0xff] %vm618_vm1, %v1701_v8  ;;  %1932 = vst.msk [vmem:[#allocation4 + $0x60] sm:$0xff] %vm618_vm1, %v1697_v21 }
 0x3b4   : > { %1210 = vbcast.lane.b32.xlu0 %v1180_v12, 312 }
 0x3b5   : > { %1167 = vbcast.lane.b32.xlu1 %v1145_v37, 296 }
 0x3b6   : > { %v1709_v9 = vpop.permute.xlu0 %1708  ;;  %v1705_v24 = vpop.permute.xlu1 %1704 }
 0x3b7   : > { %1935 = vst.msk [vmem:[#allocation4 + $0x78] sm:$0xff] %vm618_vm1, %v1709_v9  ;;  %1934 = vst.msk [vmem:[#allocation4 + $0x70] sm:$0xff] %vm618_vm1, %v1705_v24 }
 0x3b8   : > { %1221 = vbcast.lane.b32.xlu0 %v1215_v35, 264 }
 0x3b9   : > { %1171 = vbcast.lane.b32.xlu1 %v1145_v37, 304 }
 0x3ba   : > { %v1720_v25 = vpop.permute.xlu0 %1719  ;;  %v1716_v45 = vpop.permute.xlu1 %1715 }
 0x3bb   : > { %1937 = vst.msk [vmem:[#allocation4 + $0x88] sm:$0xff] %vm618_vm1, %v1720_v25  ;;  %1936 = vst.msk [vmem:[#allocation4 + $0x80] sm:$0xff] %vm618_vm1, %v1716_v45  ;;  %v3415_v45 = vrot.slane %v3124_v22, %v2960_v55 }
 0x3bc   : > { %1229 = vbcast.lane.b32.xlu0 %v1215_v35, 280 }
 0x3bd   : > { %1175 = vbcast.lane.b32.xlu1 %v1145_v37, 312 }
 0x3be   : > { %v1728_v28 = vpop.permute.xlu0 %1727  ;;  %v1724_v63 = vpop.permute.xlu1 %1723 }
 0x3bf   : > { %1939 = vst.msk [vmem:[#allocation4 + $0x98] sm:$0xff] %vm618_vm1, %v1728_v28  ;;  %1938 = vst.msk [vmem:[#allocation4 + $0x90] sm:$0xff] %vm618_vm1, %v1724_v63 }
 0x3c0   : > { %1237 = vbcast.lane.b32.xlu0 %v1215_v35, 296 }
 0x3c1   : > { %1182 = vbcast.lane.b32.xlu1 %v1180_v12, 256 }
 0x3c2   : > { %v1736_v31 = vpop.permute.xlu0 %1735  ;;  %v1732_v13 = vpop.permute.xlu1 %1731 }
 0x3c3   : > { %1941 = vst.msk [vmem:[#allocation4 + $0xa8] sm:$0xff] %vm618_vm1, %v1736_v31  ;;  %1940 = vst.msk [vmem:[#allocation4 + $0xa0] sm:$0xff] %vm618_vm1, %v1732_v13 }
 0x3c4   : > { %1245 = vbcast.lane.b32.xlu0 %v1215_v35, 312 }
 0x3c5   : > { %1190 = vbcast.lane.b32.xlu1 %v1180_v12, 272 }
 0x3c6   : > { %v1744_v51 = vpop.permute.xlu0 %1743  ;;  %v1740_v32 = vpop.permute.xlu1 %1739 }
 0x3c7   : > { %1943 = vst.msk [vmem:[#allocation4 + $0xb8] sm:$0xff] %vm618_vm1, %v1744_v51  ;;  %1942 = vst.msk [vmem:[#allocation4 + $0xb0] sm:$0xff] %vm618_vm1, %v1740_v32 }
 0x3c8   : > { %1256 = vbcast.lane.b32.xlu0 %v1250_v46, 264 }
 0x3c9   : > { %1198 = vbcast.lane.b32.xlu1 %v1180_v12, 288 }
 0x3ca   : > { %v1755_v47 = vpop.permute.xlu0 %1754  ;;  %v1751_v15 = vpop.permute.xlu1 %1750 }
 0x3cb   : > { %1945 = vst.msk [vmem:[#allocation4 + $0xc8] sm:$0xff] %vm618_vm1, %v1755_v47  ;;  %1944 = vst.msk [vmem:[#allocation4 + $0xc0] sm:$0xff] %vm618_vm1, %v1751_v15 }
 0x3cc   : > { %1264 = vbcast.lane.b32.xlu0 %v1250_v46, 280 }
 0x3cd   : > { %1206 = vbcast.lane.b32.xlu1 %v1180_v12, 304 }
 0x3ce   : > { %v1763_v19 = vpop.permute.xlu0 %1762  ;;  %v1759_v40 = vpop.permute.xlu1 %1758 }
 0x3cf   : > { %1947 = vst.msk [vmem:[#allocation4 + $0xd8] sm:$0xff] %vm618_vm1, %v1763_v19  ;;  %1946 = vst.msk [vmem:[#allocation4 + $0xd0] sm:$0xff] %vm618_vm1, %v1759_v40 }
 0x3d0   : > { %1272 = vbcast.lane.b32.xlu0 %v1250_v46, 296 }
 0x3d1   : > { %1217 = vbcast.lane.b32.xlu1 %v1215_v35, 256 }
 0x3d2   : > { %v1771_v43 = vpop.permute.xlu0 %1770  ;;  %v1767_v52 = vpop.permute.xlu1 %1766 }
 0x3d3   : > { %1949 = vst.msk [vmem:[#allocation4 + $0xe8] sm:$0xff] %vm618_vm1, %v1771_v43  ;;  %1948 = vst.msk [vmem:[#allocation4 + $0xe0] sm:$0xff] %vm618_vm1, %v1767_v52  ;;  %v1468_v43 = vcombine.high %v3023_v0, %v3023_v0 }
 0x3d4   : > { %1280 = vbcast.lane.b32.xlu0 %v1250_v46, 312 }
 0x3d5   : > { %1225 = vbcast.lane.b32.xlu1 %v1215_v35, 272 }
 0x3d6   : > { %v1779_v29 = vpop.permute.xlu0 %1778  ;;  %v1775_v44 = vpop.permute.xlu1 %1774 }
 0x3d7   : > { %1951 = vst.msk [vmem:[#allocation4 + $0xf8] sm:$0xff] %vm618_vm1, %v1779_v29  ;;  %1950 = vst.msk [vmem:[#allocation4 + $0xf0] sm:$0xff] %vm618_vm1, %v1775_v44 }
 0x3d8   : > { %1291 = vbcast.lane.b32.xlu0 %v1285_v48, 264 }
 0x3d9   : > { %1233 = vbcast.lane.b32.xlu1 %v1215_v35, 288 }
 0x3da   : > { %v1790_v20 = vpop.permute.xlu0 %1789 }
 0x3db   : > { %v1786_v49 = vpop.permute.xlu1 %1785  ;;  %1953 = vst.msk [vmem:[#allocation4 + $0x108] sm:$0xff] %vm618_vm1, %v1790_v20 }
 0x3dc   : > { %1952 = vst.msk [vmem:[#allocation4 + $0x100] sm:$0xff] %vm618_vm1, %v1786_v49  ;;  %1299 = vbcast.lane.b32.xlu0 %v1285_v48, 280 }
 0x3dd   : > { %1241 = vbcast.lane.b32.xlu1 %v1215_v35, 304 }
 0x3de   : > { %v1798_v53 = vpop.permute.xlu0 %1797 }
 0x3df   : > { %v1794_v54 = vpop.permute.xlu1 %1793  ;;  %1955 = vst.msk [vmem:[#allocation4 + $0x118] sm:$0xff] %vm618_vm1, %v1798_v53 }
 0x3e0   : > { %1954 = vst.msk [vmem:[#allocation4 + $0x110] sm:$0xff] %vm618_vm1, %v1794_v54  ;;  %1307 = vbcast.lane.b32.xlu0 %v1285_v48, 296 }
 0x3e1   : > { %1252 = vbcast.lane.b32.xlu1 %v1250_v46, 256 }
 0x3e2   : > { %v1806_v50 = vpop.permute.xlu0 %1805 }
 0x3e3   : > { %v1802_v33 = vpop.permute.xlu1 %1801  ;;  %1957 = vst.msk [vmem:[#allocation4 + $0x128] sm:$0xff] %vm618_vm1, %v1806_v50 }
 0x3e4   : > { %1956 = vst.msk [vmem:[#allocation4 + $0x120] sm:$0xff] %vm618_vm1, %v1802_v33  ;;  %1315 = vbcast.lane.b32.xlu0 %v1285_v48, 312 }
 0x3e5   : > { %1260 = vbcast.lane.b32.xlu1 %v1250_v46, 272 }
 0x3e6   : > { %v1814_v16 = vpop.permute.xlu0 %1813 }
 0x3e7   : > { %v1810_v36 = vpop.permute.xlu1 %1809  ;;  %1959 = vst.msk [vmem:[#allocation4 + $0x138] sm:$0xff] %vm618_vm1, %v1814_v16 }
 0x3e8   : > { %1958 = vst.msk [vmem:[#allocation4 + $0x130] sm:$0xff] %vm618_vm1, %v1810_v36  ;;  %1326 = vbcast.lane.b32.xlu0 %v2992_v39, 264 }
 0x3e9   : > { %1268 = vbcast.lane.b32.xlu1 %v1250_v46, 288 }
 0x3ea   : > { %v1825_v56 = vpop.permute.xlu0 %1824 }
 0x3eb   : > { %v1821_v34 = vpop.permute.xlu1 %1820  ;;  %1961 = vst.msk [vmem:[#allocation4 + $0x148] sm:$0xff] %vm618_vm1, %v1825_v56 }
 0x3ec   : > { %1960 = vst.msk [vmem:[#allocation4 + $0x140] sm:$0xff] %vm618_vm1, %v1821_v34  ;;  %1334 = vbcast.lane.b32.xlu0 %v2992_v39, 280 }
 0x3ed   : > { %1276 = vbcast.lane.b32.xlu1 %v1250_v46, 304 }
 0x3ee   : > { %v1833_v58 = vpop.permute.xlu0 %1832 }
 0x3ef   : > { %v1829_v60 = vpop.permute.xlu1 %1828  ;;  %1963 = vst.msk [vmem:[#allocation4 + $0x158] sm:$0xff] %vm618_vm1, %v1833_v58  ;;  %v1470_v58 = vcombine.high %v3124_v22, %v3124_v22 }
 0x3f0   : > { %1962 = vst.msk [vmem:[#allocation4 + $0x150] sm:$0xff] %vm618_vm1, %v1829_v60  ;;  %1342 = vbcast.lane.b32.xlu0 %v2992_v39, 296 }
 0x3f1   : > { %1287 = vbcast.lane.b32.xlu1 %v1285_v48, 256 }
 0x3f2   : > { %v1841_v1 = vpop.permute.xlu0 %1840 }
 0x3f3   : > { %v1837_v59 = vpop.permute.xlu1 %1836  ;;  %1965 = vst.msk [vmem:[#allocation4 + $0x168] sm:$0xff] %vm618_vm1, %v1841_v1 }
 0x3f4   : > { %1964 = vst.msk [vmem:[#allocation4 + $0x160] sm:$0xff] %vm618_vm1, %v1837_v59  ;;  %1350 = vbcast.lane.b32.xlu0 %v2992_v39, 312 }
 0x3f5   : > { %1295 = vbcast.lane.b32.xlu1 %v1285_v48, 272 }
 0x3f6   : > { %v1849_v4 = vpop.permute.xlu0 %1848 }
 0x3f7   : > { %v1845_v61 = vpop.permute.xlu1 %1844  ;;  %1967 = vst.msk [vmem:[#allocation4 + $0x178] sm:$0xff] %vm618_vm1, %v1849_v4  ;;  %v1487_v4 = vrot.slane %v1470_v58, %v2960_v55 }
 0x3f8   : > { %1966 = vst.msk [vmem:[#allocation4 + $0x170] sm:$0xff] %vm618_vm1, %v1845_v61  ;;  %1361 = vbcast.lane.b32.xlu0 %v2997_v41, 264 }
 0x3f9   : > { %1303 = vbcast.lane.b32.xlu1 %v1285_v48, 288 }
 0x3fa   : > { %v1860_v6 = vpop.permute.xlu0 %1859 }
 0x3fb   : > { %v1856_v5 = vpop.permute.xlu1 %1855  ;;  %1969 = vst.msk [vmem:[#allocation4 + $0x188] sm:$0xff] %vm618_vm1, %v1860_v6 }
 0x3fc   : > { %1968 = vst.msk [vmem:[#allocation4 + $0x180] sm:$0xff] %vm618_vm1, %v1856_v5  ;;  %1369 = vbcast.lane.b32.xlu0 %v2997_v41, 280 }
 0x3fd   : > { %1311 = vbcast.lane.b32.xlu1 %v1285_v48, 304  ;;  %v3436_v48 = vrot.slane %v1468_v43, %v2960_v55 }
 0x3fe   : > { %v1868_v30 = vpop.permute.xlu0 %1867 }
 0x3ff   : > { %v1864_v38 = vpop.permute.xlu1 %1863  ;;  %1971 = vst.msk [vmem:[#allocation4 + $0x198] sm:$0xff] %vm618_vm1, %v1868_v30 }
 0x400   : > { %1970 = vst.msk [vmem:[#allocation4 + $0x190] sm:$0xff] %vm618_vm1, %v1864_v38  ;;  %1377 = vbcast.lane.b32.xlu0 %v2997_v41, 296 }
 0x401   : > { %1322 = vbcast.lane.b32.xlu1 %v2992_v39, 256 }
 0x402   : > { %v1876_v26 = vpop.permute.xlu0 %1875 }
 0x403   : > { %v1872_v14 = vpop.permute.xlu1 %1871  ;;  %1973 = vst.msk [vmem:[#allocation4 + $0x1a8] sm:$0xff] %vm618_vm1, %v1876_v26 }
 0x404   : > { %1972 = vst.msk [vmem:[#allocation4 + $0x1a0] sm:$0xff] %vm618_vm1, %v1872_v14  ;;  %1385 = vbcast.lane.b32.xlu0 %v2997_v41, 312 }
 0x405   : > { %1330 = vbcast.lane.b32.xlu1 %v2992_v39, 272 }
 0x406   : > { %v1884_v7 = vpop.permute.xlu0 %1883 }
 0x407   : > { %v1880_v57 = vpop.permute.xlu1 %1879  ;;  %1975 = vst.msk [vmem:[#allocation4 + $0x1b8] sm:$0xff] %vm618_vm1, %v1884_v7 }
 0x408   : > { %1974 = vst.msk [vmem:[#allocation4 + $0x1b0] sm:$0xff] %vm618_vm1, %v1880_v57  ;;  %1396 = vbcast.lane.b32.xlu0 %v3002_v42, 264 }
 0x409   : > { %1338 = vbcast.lane.b32.xlu1 %v2992_v39, 288 }
 0x40a   : > { %v1895_v17 = vpop.permute.xlu0 %1894 }
 0x40b   : > { %v1891_v18 = vpop.permute.xlu1 %1890  ;;  %1977 = vst.msk [vmem:[#allocation4 + $0x1c8] sm:$0xff] %vm618_vm1, %v1895_v17 }
 0x40c   : > { %1976 = vst.msk [vmem:[#allocation4 + $0x1c0] sm:$0xff] %vm618_vm1, %v1891_v18  ;;  %1404 = vbcast.lane.b32.xlu0 %v3002_v42, 280 }
 0x40d   : > { %1346 = vbcast.lane.b32.xlu1 %v2992_v39, 304  ;;  %v1475_v39 = vrot.slane %v3023_v0, %v2960_v55 }
 0x40e   : > { %v1903_v8 = vpop.permute.xlu0 %1902 }
 0x40f   : > { %v1899_v21 = vpop.permute.xlu1 %1898  ;;  %1979 = vst.msk [vmem:[#allocation4 + $0x1d8] sm:$0xff] %vm618_vm1, %v1903_v8 }
 0x410   : > { %1978 = vst.msk [vmem:[#allocation4 + $0x1d0] sm:$0xff] %vm618_vm1, %v1899_v21  ;;  %1412 = vbcast.lane.b32.xlu0 %v3002_v42, 296 }
 0x411   : > { %1357 = vbcast.lane.b32.xlu1 %v2997_v41, 256 }
 0x412   : > { %v1911_v3 = vpop.permute.xlu0 %1910 }
 0x413   : > { %v1907_v37 = vpop.permute.xlu1 %1906  ;;  %1981 = vst.msk [vmem:[#allocation4 + $0x1e8] sm:$0xff] %vm618_vm1, %v1911_v3 }
 0x414   : > { %1980 = vst.msk [vmem:[#allocation4 + $0x1e0] sm:$0xff] %vm618_vm1, %v1907_v37  ;;  %1420 = vbcast.lane.b32.xlu0 %v3002_v42, 312 }
 0x415   : > { %1365 = vbcast.lane.b32.xlu1 %v2997_v41, 272 }
 0x416   : > { %v1156_v9 = vpop.permute.xlu0 %1155 }
 0x417   : > { %v1148_v24 = vpop.permute.xlu1 %1147  ;;  %v1514_v12 = vmul.f32 %v1475_v39, %v1156_v9 }
 0x418   : > { %v1512_v25 = vmul.f32 %v1475_v39, %v1148_v24  ;;  %1918 = vbcast.lane.b32.xlu0 %v3307_v2, 312 }
 0x419   : > { %1373 = vbcast.lane.b32.xlu1 %v2997_v41, 288  ;;  %1578 = vst.msk [vmem:[#allocation3 + $0x10] sm:$0xff] %vm618_vm1, %v1514_v12 }
 0x41a   : > { %1576 = vst.msk [vmem:[#allocation3] sm:$0xff] %vm618_vm1, %v1512_v25  ;;  %v1187_v28 = vpop.permute.xlu0 %1186 }
 0x41b   : > { %v1152_v63 = vpop.permute.xlu1 %1151  ;;  %v1521_v31 = vmul.f32 %v3415_v45, %v1187_v28 }
 0x41c   : > { %v1513_v13 = vmul.f32 %v1475_v39, %v1152_v63 }
 0x41d   : > { %1381 = vbcast.lane.b32.xlu1 %v2997_v41, 304  ;;  %1585 = vst.msk [vmem:[#allocation3 + $0x48] sm:$0xff] %vm618_vm1, %v1521_v31 }
 0x41e   : > { %1577 = vst.msk [vmem:[#allocation3 + $0x8] sm:$0xff] %vm618_vm1, %v1513_v13  ;;  %v1195_v51 = vpop.permute.xlu0 %1194 }
 0x41f   : > { %v1160_v32 = vpop.permute.xlu1 %1159  ;;  %v1523_v35 = vmul.f32 %v3415_v45, %v1195_v51 }
 0x420   : > { %v1515_v47 = vmul.f32 %v1475_v39, %v1160_v32 }
 0x421   : > { %1392 = vbcast.lane.b32.xlu1 %v3002_v42, 256  ;;  %1587 = vst.msk [vmem:[#allocation3 + $0x58] sm:$0xff] %vm618_vm1, %v1523_v35 }
 0x422   : > { %1579 = vst.msk [vmem:[#allocation3 + $0x18] sm:$0xff] %vm618_vm1, %v1515_v47  ;;  %v1203_v15 = vpop.permute.xlu0 %1202 }
 0x423   : > { %v1164_v19 = vpop.permute.xlu1 %1163  ;;  %v1525_v40 = vmul.f32 %v3415_v45, %v1203_v15 }
 0x424   : > { %v1516_v41 = vmul.f32 %v1475_v39, %v1164_v19 }
 0x425   : > { %1400 = vbcast.lane.b32.xlu1 %v3002_v42, 272  ;;  %1589 = vst.msk [vmem:[#allocation3 + $0x68] sm:$0xff] %vm618_vm1, %v1525_v40 }
 0x426   : > { %1580 = vst.msk [vmem:[#allocation3 + $0x20] sm:$0xff] %vm618_vm1, %v1516_v41  ;;  %v1211_v52 = vpop.permute.xlu0 %1210  ;;  %v3489_v41 = vrot.slane %v3127_v23, %v2960_v55 }
 0x427   : > { %v1168_v29 = vpop.permute.xlu1 %1167  ;;  %v1527_v44 = vmul.f32 %v3415_v45, %v1211_v52 }
 0x428   : > { %v1517_v46 = vmul.f32 %v1475_v39, %v1168_v29 }
 0x429   : > { %1408 = vbcast.lane.b32.xlu1 %v3002_v42, 288  ;;  %1591 = vst.msk [vmem:[#allocation3 + $0x78] sm:$0xff] %vm618_vm1, %v1527_v44 }
 0x42a   : > { %1581 = vst.msk [vmem:[#allocation3 + $0x28] sm:$0xff] %vm618_vm1, %v1517_v46  ;;  %v1222_v20 = vpop.permute.xlu0 %1221 }
 0x42b   : > { %v1172_v0 = vpop.permute.xlu1 %1171  ;;  %v1529_v49 = vmul.f32 %v3436_v48, %v1222_v20 }
 0x42c   : > { %v1518_v53 = vmul.f32 %v1475_v39, %v1172_v0 }
 0x42d   : > { %1416 = vbcast.lane.b32.xlu1 %v3002_v42, 304  ;;  %1593 = vst.msk [vmem:[#allocation3 + $0x88] sm:$0xff] %vm618_vm1, %v1529_v49 }
 0x42e   : > { %1582 = vst.msk [vmem:[#allocation3 + $0x30] sm:$0xff] %vm618_vm1, %v1518_v53  ;;  %v1230_v54 = vpop.permute.xlu0 %1229 }
 0x42f   : > { %v1176_v50 = vpop.permute.xlu1 %1175  ;;  %v1531_v33 = vmul.f32 %v3436_v48, %v1230_v54 }
 0x430   : > { %v1519_v16 = vmul.f32 %v1475_v39, %v1176_v50  ;;  %v3471_v39 = vrot.slane %v3121_v10, %v2960_v55 }
 0x431   : > { %1914 = vbcast.lane.b32.xlu1 %v3307_v2, 304  ;;  %1595 = vst.msk [vmem:[#allocation3 + $0x98] sm:$0xff] %vm618_vm1, %v1531_v33  ;;  %v1469_v33 = vcombine.high %v3121_v10, %v3121_v10 }
 0x432   : > { %1583 = vst.msk [vmem:[#allocation3 + $0x38] sm:$0xff] %vm618_vm1, %v1519_v16  ;;  %v1238_v36 = vpop.permute.xlu0 %1237 }
 0x433   : > { %v1183_v56 = vpop.permute.xlu1 %1182  ;;  %v1533_v34 = vmul.f32 %v3436_v48, %v1238_v36 }
 0x434   : > { %v1520_v42 = vmul.f32 %v3415_v45, %v1183_v56 }
 0x435   : > { %1597 = vst.msk [vmem:[#allocation3 + $0xa8] sm:$0xff] %vm618_vm1, %v1533_v34 }
 0x436   : > { %1584 = vst.msk [vmem:[#allocation3 + $0x40] sm:$0xff] %vm618_vm1, %v1520_v42  ;;  %v1246_v60 = vpop.permute.xlu0 %1245  ;;  %v1499_v42 = vrot.slane %v1469_v33, %v2960_v55 }
 0x437   : > { %v1191_v1 = vpop.permute.xlu1 %1190  ;;  %v1535_v2 = vmul.f32 %v3436_v48, %v1246_v60 }
 0x438   : > { %v1522_v59 = vmul.f32 %v3415_v45, %v1191_v1 }
 0x439   : > { %1599 = vst.msk [vmem:[#allocation3 + $0xb8] sm:$0xff] %vm618_vm1, %v1535_v2 }
 0x43a   : > { %1586 = vst.msk [vmem:[#allocation3 + $0x50] sm:$0xff] %vm618_vm1, %v1522_v59  ;;  %v1257_v61 = vpop.permute.xlu0 %1256 }
 0x43b   : > { %v1199_v6 = vpop.permute.xlu1 %1198  ;;  %v1537_v5 = vmul.f32 %v1487_v4, %v1257_v61 }
 0x43c   : > { %v1524_v22 = vmul.f32 %v3415_v45, %v1199_v6 }
 0x43d   : > { %1601 = vst.msk [vmem:[#allocation3 + $0xc8] sm:$0xff] %vm618_vm1, %v1537_v5 }
 0x43e   : > { %1588 = vst.msk [vmem:[#allocation3 + $0x60] sm:$0xff] %vm618_vm1, %v1524_v22  ;;  %v1265_v30 = vpop.permute.xlu0 %1264 }
 0x43f   : > { %v1207_v38 = vpop.permute.xlu1 %1206  ;;  %v1539_v26 = vmul.f32 %v1487_v4, %v1265_v30 }
 0x440   : > { %v1526_v14 = vmul.f32 %v3415_v45, %v1207_v38  ;;  %v1471_v38 = vcombine.high %v3127_v23, %v3127_v23 }
 0x441   : > { %1603 = vst.msk [vmem:[#allocation3 + $0xd8] sm:$0xff] %vm618_vm1, %v1539_v26 }
 0x442   : > { %1590 = vst.msk [vmem:[#allocation3 + $0x70] sm:$0xff] %vm618_vm1, %v1526_v14  ;;  %v1273_v7 = vpop.permute.xlu0 %1272 }
 0x443   : > { %v1218_v57 = vpop.permute.xlu1 %1217  ;;  %v1541_v17 = vmul.f32 %v1487_v4, %v1273_v7 }
 0x444   : > { %v1528_v18 = vmul.f32 %v3436_v48, %v1218_v57 }
 0x445   : > { %1605 = vst.msk [vmem:[#allocation3 + $0xe8] sm:$0xff] %vm618_vm1, %v1541_v17  ;;  %v1503_v17 = vrot.slane %v1471_v38, %v2960_v55 }
 0x446   : > { %1592 = vst.msk [vmem:[#allocation3 + $0x80] sm:$0xff] %vm618_vm1, %v1528_v18  ;;  %v1281_v8 = vpop.permute.xlu0 %1280 }
 0x447   : > { %v1226_v21 = vpop.permute.xlu1 %1225  ;;  %v1543_v3 = vmul.f32 %v1487_v4, %v1281_v8 }
 0x448   : > { %v1530_v37 = vmul.f32 %v3436_v48, %v1226_v21 }
 0x449   : > { %1607 = vst.msk [vmem:[#allocation3 + $0xf8] sm:$0xff] %vm618_vm1, %v1543_v3 }
 0x44a   : > { %1594 = vst.msk [vmem:[#allocation3 + $0x90] sm:$0xff] %vm618_vm1, %v1530_v37  ;;  %v1292_v9 = vpop.permute.xlu0 %1291 }
 0x44b   : > { %v1234_v24 = vpop.permute.xlu1 %1233  ;;  %v1545_v12 = vmul.f32 %v3471_v39, %v1292_v9 }
 0x44c   : > { %v1532_v25 = vmul.f32 %v3436_v48, %v1234_v24 }
 0x44d   : > { %1609 = vst.msk [vmem:[#allocation3 + $0x108] sm:$0xff] %vm618_vm1, %v1545_v12 }
 0x44e   : > { %1596 = vst.msk [vmem:[#allocation3 + $0xa0] sm:$0xff] %vm618_vm1, %v1532_v25  ;;  %v1300_v45 = vpop.permute.xlu0 %1299 }
 0x44f   : > { %v1242_v28 = vpop.permute.xlu1 %1241  ;;  %v1547_v63 = vmul.f32 %v3471_v39, %v1300_v45 }
 0x450   : > { %v1534_v31 = vmul.f32 %v3436_v48, %v1242_v28 }
 0x451   : > { %1611 = vst.msk [vmem:[#allocation3 + $0x118] sm:$0xff] %vm618_vm1, %v1547_v63 }
 0x452   : > { %1598 = vst.msk [vmem:[#allocation3 + $0xb0] sm:$0xff] %vm618_vm1, %v1534_v31  ;;  %v1308_v13 = vpop.permute.xlu0 %1307 }
 0x453   : > { %v1253_v51 = vpop.permute.xlu1 %1252  ;;  %v1549_v32 = vmul.f32 %v3471_v39, %v1308_v13 }
 0x454   : > { %v1536_v35 = vmul.f32 %v1487_v4, %v1253_v51 }
 0x455   : > { %1613 = vst.msk [vmem:[#allocation3 + $0x128] sm:$0xff] %vm618_vm1, %v1549_v32 }
 0x456   : > { %1600 = vst.msk [vmem:[#allocation3 + $0xc0] sm:$0xff] %vm618_vm1, %v1536_v35  ;;  %v1316_v47 = vpop.permute.xlu0 %1315 }
 0x457   : > { %v1261_v15 = vpop.permute.xlu1 %1260  ;;  %v1551_v19 = vmul.f32 %v3471_v39, %v1316_v47 }
 0x458   : > { %v1538_v40 = vmul.f32 %v1487_v4, %v1261_v15 }
 0x459   : > { %1615 = vst.msk [vmem:[#allocation3 + $0x138] sm:$0xff] %vm618_vm1, %v1551_v19 }
 0x45a   : > { %1602 = vst.msk [vmem:[#allocation3 + $0xd0] sm:$0xff] %vm618_vm1, %v1538_v40  ;;  %v1327_v43 = vpop.permute.xlu0 %1326 }
 0x45b   : > { %v1269_v52 = vpop.permute.xlu1 %1268  ;;  %v1553_v29 = vmul.f32 %v3489_v41, %v1327_v43 }
 0x45c   : > { %v1540_v44 = vmul.f32 %v1487_v4, %v1269_v52 }
 0x45d   : > { %1617 = vst.msk [vmem:[#allocation3 + $0x148] sm:$0xff] %vm618_vm1, %v1553_v29 }
 0x45e   : > { %1604 = vst.msk [vmem:[#allocation3 + $0xe0] sm:$0xff] %vm618_vm1, %v1540_v44  ;;  %v1335_v46 = vpop.permute.xlu0 %1334 }
 0x45f   : > { %v1277_v48 = vpop.permute.xlu1 %1276  ;;  %v1555_v20 = vmul.f32 %v3489_v41, %v1335_v46 }
 0x460   : > { %v1542_v0 = vmul.f32 %v1487_v4, %v1277_v48 }
 0x461   : > { %1619 = vst.msk [vmem:[#allocation3 + $0x158] sm:$0xff] %vm618_vm1, %v1555_v20 }
 0x462   : > { %1606 = vst.msk [vmem:[#allocation3 + $0xf0] sm:$0xff] %vm618_vm1, %v1542_v0  ;;  %v1343_v49 = vpop.permute.xlu0 %1342 }
 0x463   : > { %v1288_v53 = vpop.permute.xlu1 %1287  ;;  %v1557_v54 = vmul.f32 %v3489_v41, %v1343_v49 }
 0x464   : > { %v1544_v50 = vmul.f32 %v3471_v39, %v1288_v53 }
 0x465   : > { %1621 = vst.msk [vmem:[#allocation3 + $0x168] sm:$0xff] %vm618_vm1, %v1557_v54 }
 0x466   : > { %1608 = vst.msk [vmem:[#allocation3 + $0x100] sm:$0xff] %vm618_vm1, %v1544_v50  ;;  %v1351_v16 = vpop.permute.xlu0 %1350 }
 0x467   : > { %v1296_v36 = vpop.permute.xlu1 %1295  ;;  %v1559_v56 = vmul.f32 %v3489_v41, %v1351_v16 }
 0x468   : > { %v1546_v34 = vmul.f32 %v3471_v39, %v1296_v36 }
 0x469   : > { %1623 = vst.msk [vmem:[#allocation3 + $0x178] sm:$0xff] %vm618_vm1, %v1559_v56 }
 0x46a   : > { %1610 = vst.msk [vmem:[#allocation3 + $0x110] sm:$0xff] %vm618_vm1, %v1546_v34  ;;  %v1362_v58 = vpop.permute.xlu0 %1361 }
 0x46b   : > { %v1304_v60 = vpop.permute.xlu1 %1303  ;;  %v1561_v1 = vmul.f32 %v1499_v42, %v1362_v58 }
 0x46c   : > { %v1548_v10 = vmul.f32 %v3471_v39, %v1304_v60 }
 0x46d   : > { %1625 = vst.msk [vmem:[#allocation3 + $0x188] sm:$0xff] %vm618_vm1, %v1561_v1 }
 0x46e   : > { %1612 = vst.msk [vmem:[#allocation3 + $0x120] sm:$0xff] %vm618_vm1, %v1548_v10  ;;  %v1370_v2 = vpop.permute.xlu0 %1369 }
 0x46f   : > { %v1312_v59 = vpop.permute.xlu1 %1311  ;;  %v1563_v4 = vmul.f32 %v1499_v42, %v1370_v2 }
 0x470   : > { %v1550_v61 = vmul.f32 %v3471_v39, %v1312_v59 }
 0x471   : > { %1627 = vst.msk [vmem:[#allocation3 + $0x198] sm:$0xff] %vm618_vm1, %v1563_v4 }
 0x472   : > { %1614 = vst.msk [vmem:[#allocation3 + $0x130] sm:$0xff] %vm618_vm1, %v1550_v61  ;;  %v1378_v6 = vpop.permute.xlu0 %1377 }
 0x473   : > { %v1323_v5 = vpop.permute.xlu1 %1322  ;;  %v1565_v22 = vmul.f32 %v1499_v42, %v1378_v6 }
 0x474   : > { %v1552_v30 = vmul.f32 %v3489_v41, %v1323_v5 }
 0x475   : > { %1629 = vst.msk [vmem:[#allocation3 + $0x1a8] sm:$0xff] %vm618_vm1, %v1565_v22 }
 0x476   : > { %1616 = vst.msk [vmem:[#allocation3 + $0x140] sm:$0xff] %vm618_vm1, %v1552_v30  ;;  %v1386_v26 = vpop.permute.xlu0 %1385 }
 0x477   : > { %v1331_v14 = vpop.permute.xlu1 %1330  ;;  %v1567_v7 = vmul.f32 %v1499_v42, %v1386_v26 }
 0x478   : > { %v1554_v57 = vmul.f32 %v3489_v41, %v1331_v14 }
 0x479   : > { %1631 = vst.msk [vmem:[#allocation3 + $0x1b8] sm:$0xff] %vm618_vm1, %v1567_v7 }
 0x47a   : > { %1618 = vst.msk [vmem:[#allocation3 + $0x150] sm:$0xff] %vm618_vm1, %v1554_v57  ;;  %v1397_v18 = vpop.permute.xlu0 %1396 }
 0x47b   : > { %v1339_v8 = vpop.permute.xlu1 %1338  ;;  %v1569_v21 = vmul.f32 %v1503_v17, %v1397_v18 }
 0x47c   : > { %v1556_v23 = vmul.f32 %v3489_v41, %v1339_v8 }
 0x47d   : > { %1633 = vst.msk [vmem:[#allocation3 + $0x1c8] sm:$0xff] %vm618_vm1, %v1569_v21 }
 0x47e   : > { %1620 = vst.msk [vmem:[#allocation3 + $0x160] sm:$0xff] %vm618_vm1, %v1556_v23  ;;  %v1405_v3 = vpop.permute.xlu0 %1404 }
 0x47f   : > { %v1347_v37 = vpop.permute.xlu1 %1346  ;;  %v1571_v39 = vmul.f32 %v1503_v17, %v1405_v3 }
 0x480   : > { %v1558_v9 = vmul.f32 %v3489_v41, %v1347_v37 }
 0x481   : > { %1635 = vst.msk [vmem:[#allocation3 + $0x1d8] sm:$0xff] %vm618_vm1, %v1571_v39 }
 0x482   : > { %1622 = vst.msk [vmem:[#allocation3 + $0x170] sm:$0xff] %vm618_vm1, %v1558_v9  ;;  %v1413_v55 = vpop.permute.xlu0 %1412 }
 0x483   : > { %v1358_v24 = vpop.permute.xlu1 %1357  ;;  %v1573_v12 = vmul.f32 %v1503_v17, %v1413_v55 }
 0x484   : > { %v1560_v25 = vmul.f32 %v1499_v42, %v1358_v24 }
 0x485   : > { %1637 = vst.msk [vmem:[#allocation3 + $0x1e8] sm:$0xff] %vm618_vm1, %v1573_v12 }
 0x486   : > { %1624 = vst.msk [vmem:[#allocation3 + $0x180] sm:$0xff] %vm618_vm1, %v1560_v25  ;;  %v1421_v45 = vpop.permute.xlu0 %1420 }
 0x487   : > { %v1366_v28 = vpop.permute.xlu1 %1365  ;;  %v1575_v63 = vmul.f32 %v1503_v17, %v1421_v45 }
 0x488   : > { %v1562_v31 = vmul.f32 %v1499_v42, %v1366_v28 }
 0x489   : > { %1639 = vst.msk [vmem:[#allocation3 + $0x1f8] sm:$0xff] %vm618_vm1, %v1575_v63 }
 0x48a   : > { %1626 = vst.msk [vmem:[#allocation3 + $0x190] sm:$0xff] %vm618_vm1, %v1562_v31  ;;  %v1919_v13 = vpop.permute.xlu0 %1918 }
 0x48b   : > { %v1374_v51 = vpop.permute.xlu1 %1373  ;;  %1983 = vst.msk [vmem:[#allocation4 + $0x1f8] sm:$0xff] %vm618_vm1, %v1919_v13 }
 0x48c   : > { %v1564_v32 = vmul.f32 %v1499_v42, %v1374_v51 }
 0x48e   : > { %1628 = vst.msk [vmem:[#allocation3 + $0x1a0] sm:$0xff] %vm618_vm1, %v1564_v32 }
 0x48f   : > { %v1382_v35 = vpop.permute.xlu1 %1381 }
 0x490   : > { %v1566_v47 = vmul.f32 %v1499_v42, %v1382_v35 }
 0x492   : > { %1630 = vst.msk [vmem:[#allocation3 + $0x1b0] sm:$0xff] %vm618_vm1, %v1566_v47 }
 0x493   : > { %v1393_v15 = vpop.permute.xlu1 %1392 }
 0x494   : > { %v1568_v19 = vmul.f32 %v1503_v17, %v1393_v15 }
 0x496   : > { %1632 = vst.msk [vmem:[#allocation3 + $0x1c0] sm:$0xff] %vm618_vm1, %v1568_v19 }
 0x497   : > { %v1401_v40 = vpop.permute.xlu1 %1400 }
 0x498   : > { %v1570_v41 = vmul.f32 %v1503_v17, %v1401_v40 }
 0x49a   : > { %1634 = vst.msk [vmem:[#allocation3 + $0x1d0] sm:$0xff] %vm618_vm1, %v1570_v41 }
 0x49b   : > { %v1409_v43 = vpop.permute.xlu1 %1408 }
 0x49c   : > { %v1572_v52 = vmul.f32 %v1503_v17, %v1409_v43 }
 0x49e   : > { %1636 = vst.msk [vmem:[#allocation3 + $0x1e0] sm:$0xff] %vm618_vm1, %v1572_v52 }
 0x49f   : > { %v1417_v29 = vpop.permute.xlu1 %1416 }
 0x4a0   : > { %v1574_v44 = vmul.f32 %v1503_v17, %v1417_v29 }
 0x4a2   : > { %1638 = vst.msk [vmem:[#allocation3 + $0x1f0] sm:$0xff] %vm618_vm1, %v1574_v44 }
 0x4a3   : > { %v1915_v46 = vpop.permute.xlu1 %1914 }
 0x4a4   : > { %1982 = vst.msk [vmem:[#allocation4 + $0x1f0] sm:$0xff] %vm618_vm1, %v1915_v46 }
 0x4a5 LB: >> { %s2305_s19 = sshll.u32 %s2713_s14, 6  ;;  %v2000_v48 = vld [vmem:[#allocation5] sm:$0xff]  ;;  %v2001_v20 = vld [vmem:[#allocation5 + $0x8] sm:$0xff]  ;;  %v2002_v0 = vld [vmem:[#allocation5 + $0x10] sm:$0xff]  ;;  %vm2080_vm8 = vcmask 516096   ;;  %s2079_s12 = scalar_lea.vmem [#allocation6], %s2713_s14  ;;  %s2713_s14 = sphi %s3544_s14, %s1989_s14  }
 0x4a6   : >> { %v2003_v49 = vld [vmem:[#allocation5 + $0x18] sm:$0xff]  ;;  %s3550_s23 = scalar_lea.vmem [#allocation2], %s2305_s19  ;;  %s3553_s26 = scalar_lea.vmem [#allocation3], %s2305_s19  ;;  %v2004_v33 = vld [vmem:[#allocation5 + $0x20] sm:$0xff]  ;;  %v2005_v42 = vld [vmem:[#allocation5 + $0x28] sm:$0xff] }
 0x4a7   : >> { %v1992_v53 = vld [vmem:[%s3550_s23] sm:$0xff]  ;;  %v1993_v50 = vld [vmem:[%s3550_s23 + $0x8] sm:$0xff]  ;;  %s3557_s29 = scalar_lea.vmem [#allocation4], %s2305_s19  ;;  %v1994_v60 = vld [vmem:[%s3550_s23 + $0x10] sm:$0xff]  ;;  %s1989_s14 = sadd.s32 1, %s2713_s14  }
 0x4a8   : >> { %v2008_v16 = vmul.f32 %v2000_v48, %v1992_v53  ;;  %v2009_v56 = vmul.f32 %v2001_v20, %v1993_v50  ;;  %v2010_v59 = vmul.f32 %v2002_v0, %v1994_v60  ;;  %v1995_v4 = vld [vmem:[%s3550_s23 + $0x18] sm:$0xff]  ;;  %v2006_v6 = vld [vmem:[#allocation5 + $0x30] sm:$0xff]  ;;  %v1996_v30 = vld [vmem:[%s3550_s23 + $0x20] sm:$0xff]  ;;  %p1986_p10 = scmp.ge.s32.totalorder %s1989_s14, 8  }
 0x4a9   : >> { %v2017_v54 = vld [vmem:[%s3553_s26] sm:$0xff]  ;;  %v2018_v34 = vld [vmem:[%s3553_s26 + $0x8] sm:$0xff]  ;;  %v2019_v1 = vld [vmem:[%s3553_s26 + $0x10] sm:$0xff]  ;;  %v2011_v22 = vmul.f32 %v2003_v49, %v1995_v4  ;;  %v2012_v17 = vmul.f32 %v2004_v33, %v1996_v30  ;;  %2349 = vmatprep.subr.mxu1 (%p1986_p10), %v2721_v11  ;;  %2365 = vmatprep.mubr.msk.f32.mxu1 (%p1986_p10), %vm2722_vm2, %v2721_v11  ;;  %s2182_s25 = scalar_lea.sflag (%p1986_p10), [#allocation9], %s405_s13  ;;  %s2724_s14 = smov (%p1986_p10), [#allocation12]  }
 0x4aa   : >> { %v2025_v10 = vadd.f32 %v2017_v54, %v2008_v16  ;;  %v2026_v2 = vadd.f32 %v2018_v34, %v2009_v56  ;;  %v2020_v61 = vld [vmem:[%s3553_s26 + $0x18] sm:$0xff]  ;;  %v2021_v38 = vld [vmem:[%s3553_s26 + $0x20] sm:$0xff]  ;;  %v2027_v7 = vadd.f32 %v2019_v1, %v2010_v59  ;;  %v1997_v18 = vld [vmem:[%s3550_s23 + $0x28] sm:$0xff]  ;;  %v2092_v59 = vsub.f32 (%p1986_p10), 0.0, %v2966_v62  ;;  %s2641_s19 = sshll.u32 (%p1986_p10), %s2724_s14, 4  ;;  %s2642_s19 = int_to_ptr.vmem [resolvable:$false] %s2641_s19 }
 0x4ab   : >> { %v2042_v36 = vld [vmem:[%s3557_s29] sm:$0xff]  ;;  %v2043_v58 = vld [vmem:[%s3557_s29 + $0x8] sm:$0xff]  ;;  %v2044_v5 = vld [vmem:[%s3557_s29 + $0x10] sm:$0xff]  ;;  %v2028_v21 = vadd.f32 %v2020_v61, %v2011_v22  ;;  %v2013_v3 = vmul.f32 %v2005_v42, %v1997_v18  ;;  %v2029_v12 = vadd.f32 %v2021_v38, %v2012_v17 }
 0x4ac   : >> { %2033 = vst.msk [vmem:[#allocation5] sm:$0xff] %vm618_vm1, %v2025_v10  ;;  %v2050_v26 = vmul.f32 %v2042_v36, %v2025_v10  ;;  %2034 = vst.msk [vmem:[#allocation5 + $0x8] sm:$0xff] %vm618_vm1, %v2026_v2  ;;  %v2051_v14 = vmul.f32 %v2043_v58, %v2026_v2  ;;  %v2045_v57 = vld [vmem:[%s3557_s29 + $0x18] sm:$0xff]  ;;  %v2022_v8 = vld [vmem:[%s3553_s26 + $0x28] sm:$0xff]  ;;  %v2052_v24 = vmul.f32 %v2044_v5, %v2027_v7  ;;  %v2093_v61 = vmul.f32 (%p1986_p10), 1.442695, %v2092_v59 }
 0x4ad   : >> { %v2046_v23 = vld [vmem:[%s3557_s29 + $0x20] sm:$0xff]  ;;  %v1998_v37 = vld [vmem:[%s3550_s23 + $0x30] sm:$0xff]  ;;  %v2007_v39 = vld [vmem:[#allocation5 + $0x38] sm:$0xff]  ;;  %2035 = vst.msk [vmem:[#allocation5 + $0x10] sm:$0xff] %vm618_vm1, %v2027_v7  ;;  %v2053_v31 = vmul.f32 %v2045_v57, %v2028_v21  ;;  %v2030_v13 = vadd.f32 %v2022_v8, %v2013_v3 }
 0x4ae   : >> { %v2058_v9 = vsel %vm618_vm1, %v2050_v26, 0.0  ;;  %v2059_v55 = vsel %vm618_vm1, %v2051_v14, 0.0  ;;  %v2047_v25 = vld [vmem:[%s3557_s29 + $0x28] sm:$0xff]  ;;  %v2023_v45 = vld [vmem:[%s3553_s26 + $0x30] sm:$0xff]  ;;  %v1999_v28 = vld [vmem:[%s3550_s23 + $0x38] sm:$0xff]  ;;  %2036 = vst.msk [vmem:[#allocation5 + $0x18] sm:$0xff] %vm618_vm1, %v2028_v21  ;;  %v2014_v51 = vmul.f32 %v2006_v6, %v1998_v37  ;;  %v2054_v47 = vmul.f32 %v2046_v23, %v2029_v12 }
 0x4af   : >> { %v2060_v63 = vadd.f32 %v2059_v55, %v2058_v9  ;;  %v2024_v32 = vld [vmem:[%s3553_s26 + $0x38] sm:$0xff]  ;;  %v2061_v35 = vsel %vm618_vm1, %v2052_v24, 0.0  ;;  %2037 = vst.msk [vmem:[#allocation5 + $0x20] sm:$0xff] %vm618_vm1, %v2029_v12  ;;  %v2048_v15 = vld [vmem:[%s3557_s29 + $0x30] sm:$0xff]  ;;  %v2015_v19 = vmul.f32 %v2007_v39, %v1999_v28  ;;  %v2063_v41 = vsel %vm618_vm1, %v2053_v31, 0.0  ;;  %2038 = vst.msk [vmem:[#allocation5 + $0x28] sm:$0xff] %vm618_vm1, %v2030_v13 }
 0x4b0   : >> { %v2055_v43 = vmul.f32 %v2047_v25, %v2030_v13  ;;  %v2031_v52 = vadd.f32 %v2023_v45, %v2014_v51  ;;  %v2049_v29 = vld [vmem:[%s3557_s29 + $0x38] sm:$0xff]  ;;  %v2065_v44 = vsel %vm618_vm1, %v2054_v47, 0.0  ;;  %v2105_v2 = vld [vmem:[%s3703_s10 + $0x30] sm:$0xff] (%p1986_p10)  ;;  %v2104_v4 = vld [vmem:[%s3703_s10 + $0x28] sm:$0xff] (%p1986_p10)  ;;  %2581 = vpow2.f32 (%p1986_p10), %v2093_v61  ;;  %s2309_s29 = sshll.u32 (%p1986_p10), %s2806_s21, 7  ;;  %s2643_s23 = scalar_lea.vmem (%p1986_p10), %s2642_s19, 256 }
 0x4b1   : >> { %v2062_v40 = vadd.f32 %v2061_v35, %v2060_v63  ;;  %v2032_v46 = vadd.f32 %v2024_v32, %v2015_v19  ;;  %v2106_v10 = vld [vmem:[%s3703_s10 + $0x38] sm:$0xff] (%p1986_p10)  ;;  %v2103_v6 = vld [vmem:[%s3703_s10 + $0x20] sm:$0xff] (%p1986_p10)  ;;  %v2101_v22 = vld [vmem:[%s3703_s10 + $0x10] sm:$0xff] (%p1986_p10)  ;;  %s3647_s24 = scalar_lea.hbm (%p1986_p10), %s3704_s11, %s2309_s29 }
 0x4b2   : >> { %2039 = vst.msk [vmem:[#allocation5 + $0x30] sm:$0xff] %vm618_vm1, %v2031_v52  ;;  %v2056_v20 = vmul.f32 %v2048_v15, %v2031_v52  ;;  %v2067_v0 = vsel %vm618_vm1, %v2055_v43, 0.0  ;;  %2350 = vmatpush3.msra.mxu1 (%p1986_p10), %v2106_v10  ;;  %v2102_v5 = vld [vmem:[%s3703_s10 + $0x18] sm:$0xff] (%p1986_p10)  ;;  %v2100_v30 = vld [vmem:[%s3703_s10 + $0x8] sm:$0xff] (%p1986_p10)  ;;  %v2099_v38 = vld [vmem:[%s3703_s10] sm:$0xff] (%p1986_p10) }
 0x4b3   : >> { %v2064_v48 = vadd.f32 %v2063_v41, %v2062_v40  ;;  %2040 = vst.msk [vmem:[#allocation5 + $0x38] sm:$0xff] %vm618_vm1, %v2032_v46  ;;  %v2057_v49 = vmul.f32 %v2049_v29, %v2032_v46  ;;  %2351 = vmatprep.subr.mxu1 (%p1986_p10), %v2721_v11  ;;  %v2306_v7 = vld [vmem:[%s3702_s9] ss:$0 sm:$0xff] (%p1986_p10) }
 0x4b4   : >> { %v2069_v54 = vsel %vm618_vm1, %v2056_v20, 0.0  ;;  %2352 = vmatpush3.msra.mxu1 (%p1986_p10), %v2105_v2  ;;  %v2090_v57 = vmul.f32 (%p1986_p10), %v2306_v7, %v2971_v27 }
 0x4b5   : >> { %v2066_v53 = vadd.f32 %v2065_v44, %v2064_v48  ;;  %v2071_v33 = vsel %vm618_vm1, %v2057_v49, 0.0  ;;  %2353 = vmatprep.subr.mxu1 (%p1986_p10), %v2721_v11 }
 0x4b6   : > { %2354 = vmatpush3.msra.mxu1 (%p1986_p10), %v2104_v4 }
 0x4b7   : >> { %v2068_v50 = vadd.f32 %v2067_v0, %v2066_v53  ;;  %2355 = vmatprep.subr.mxu1 (%p1986_p10), %v2721_v11 }
 0x4b8   : > { %2356 = vmatpush3.msra.mxu1 (%p1986_p10), %v2103_v6 }
 0x4b9   : >> { %v2070_v16 = vadd.f32 %v2069_v54, %v2068_v50  ;;  %2357 = vmatprep.subr.mxu1 (%p1986_p10), %v2721_v11 }
 0x4ba   : > { %2358 = vmatpush3.msra.mxu1 (%p1986_p10), %v2102_v5 }
 0x4bb   : >> { %v2072_v36 = vadd.f32 %v2071_v33, %v2070_v16  ;;  %2359 = vmatprep.subr.mxu1 (%p1986_p10), %v2721_v11 }
 0x4bc   : > { %2360 = vmatpush3.msra.mxu1 (%p1986_p10), %v2101_v22 }
 0x4bd   : >> { %v2073_v56 = vrot.slane %v2072_v36, 4  ;;  %2361 = vmatprep.subr.mxu1 (%p1986_p10), %v2721_v11  ;;  %v2582_v26 = vpop.eup (%p1986_p10), %2581 }
 0x4be   : > { %2362 = vmatpush3.msra.mxu1 (%p1986_p10), %v2100_v30  ;;  %v2095_v14 = vadd.f32 (%p1986_p10), 1.0, %v2582_v26 }
 0x4bf   : >> { %v2074_v34 = vadd.f32 %v2073_v56, %v2072_v36  ;;  %2363 = vmatprep.subr.mxu1 (%p1986_p10), %v2721_v11 }
 0x4c0   : > { %2364 = vmatpush3.msra.mxu1 (%p1986_p10), %v2099_v38  ;;  %2583 = vrcp.f32 (%p1986_p10), %v2095_v14 }
 0x4c1   : >> { %v2075_v42 = vrot.slane %v2074_v34, 2 }
 0x4c3   : >> { %v2076_v58 = vadd.f32 %v2075_v42, %v2074_v34 }
 0x4c5   : >> { %v2077_v60 = vrot.slane %v2076_v58, 1  ;;  %1988 = sbr.rel (!%p1986_p10) target bundleno = 1189 (0x4a5), region = 119 }
 0x4c7   : >> { %v2078_v1 = vadd.f32 %v2077_v60, %v2076_v58 }
 0x4c9   : >> { %2081 = vst.msk [vmem:[%s2079_s12] sm:$0x1] %vm2080_vm8, %v2078_v1  ;;  %s2195_s12 = sshll.u32 (%p1986_p10), %s407_s30, 4  ;;  %s3649_s12 = int_to_ptr.vmem [resolvable:$true] %s2195_s12 }
 0x4ca   : > { %s2637_s21 = scalar_lea.vmem %s3649_s12, 128  ;;  %p2644_p0 = scmp.lt.s32.totalorder %s3649_s12, %s2642_s19 }
 0x4cb   : > { %p2638_p12 = scmp.ne.s32.totalorder %s3649_s12, %s2637_s21  ;;  %p2645_p1 = scmp.lt.s32.totalorder %s2643_s23, %s2637_s21 }
 0x4cd   : > { %v2584_v8 = vpop.eup %2583  ;;  %p2639_p8 = pnand %p2638_p12, %p2823_p5  ;;  %p2646_p3 = por %p2645_p1, %p2644_p0 }
 0x4ce   : > { %v2097_v21 = vmul.f32 %v2584_v8, %v2966_v62 }
 0x4cf   : > { %p2640_p11 = pneg %p2639_p8 }
 0x4d0   : > { %v2082_v17 = vld [vmem:[#allocation6] sm:$0xff] }
 0x4d1   : > { %v2091_v18 = vadd.f32 %v2090_v57, %v2082_v17  ;;  %p2647_p2 = pnand %p2646_p3, %p2640_p11 }
 0x4d3   : > { %v2098_v23 = vmul.f32 %v2097_v21, %v2091_v18 }
 0x4d5   : > { %2366 = vmatmul.mubr.msk.f32.vlgmr.msra.gmra.mxu1 %vm618_vm1, %v2098_v23 }
 0x595   : > { %v2176_v11 = vpop.f32.mrf.mxu1 }
 0x596   : > { %2180 = vst.msk [vmem:[%s407_s30] sm:$0xff] %vm413_vm0, %v2176_v11 }
 0x597   : > { %v2367_v62 = vpop.f32.mrf.mxu1 }
 0x598   : > { %2650 = shalt.err (!%p2647_p2)
}
 0x599   : > { %s2651_s16 = scalar_lea.hbm %s3647_s24, 128  ;;  %s2655_s26 = scalar_lea.hbm %s3704_s11, 256 }
 0x59a   : > { %p2652_p4 = scmp.ne.s32.totalorder %s3647_s24, %s2651_s16  ;;  %p2656_p9 = scmp.lt.s32.totalorder %s3647_s24, %s3704_s11 }
 0x59b   : > { %p2657_p7 = scmp.lt.s32.totalorder %s2655_s26, %s2651_s16 }
 0x59c   : > { %p2653_p13 = pnand %p2652_p4, %p2823_p5 }
 0x59d   : > { %p2658_p10 = por %p2657_p7, %p2656_p9 }
 0x59e   : > { %p2654_p6 = pneg %p2653_p13 }
 0x5a0   : > { %p2659_p12 = pnand %p2658_p10, %p2654_p6 }
 0x5a2   : > { %2662 = shalt.err (!%p2659_p12)
}
 0x5a3   : > { %2376 = dma.vmem_to_hbm [thread:$0]  (%p2823_p5), %s3649_s12, 128, %s3647_s24, %s2182_s25  }
 0x5a4 PF: > { %p2393_p8 = scmp.ge.s32.totalorder %s2709_s20, 2  ;;  %s2207_s22 = sand.u32 1, %s2697_s17  }
 0x5a5   : > { %p3720_p11 = scmp.ne.s32.totalorder %s3713_s28, 0  ;;  %s2208_s21 = scalar_lea.sflag [#allocation9], %s2207_s22 }
 0x5a7   : > { %p2386_p0 = pnand %p2393_p8, %p3720_p11 }
 0x5a9   : > { %p2387_p1 = pneg %p2386_p0 }
 0x5ab   : > { %2692 = dma.done.wait (%p2387_p1), %s2208_s21, 128  }
 0x5ac   : > { %2694 = vsyncadd (%p2387_p1), %s2208_s21, 4294967168  ;;  %s3721_s20 = sld [smem:[#allocation17_spill]]  ;;  %s3724_s17 = smov %s2701_s18 }
 0x5ad   : > { %s3722_s14 = sld [smem:[#allocation16_spill]] }
 0x5ae   : > { %s3723_s19 = sld [smem:[#allocation18_spill]] }
 0x5b2   : > { %p23_p3 = scmp.ge.s32.totalorder %s3721_s20, 4  }
 0x5b3   : > { %s3725_s18 = smov %s3722_s14 }
 0x5b4   :  { %25 = sbr.rel (!%p23_p3) target bundleno = 5 (0x5), region = 130 }
 0x5b9   :  { %2213 = vsyncpa [#allocation8], 1 }
 0x5ba   :  { %2215 = vsyncpa [#allocation8 + $0x1], 1 }
 0x5bb   :  { %2216 = vsyncpa [#allocation11], 1 }
 0x5bc   :  { %2217 = vsyncpa [#allocation9], 1 }
 0x5bd   :  { %2219 = vsyncpa [#allocation9 + $0x1], 1 }

</bundles_post_ra>
